<compile_context>
chip_gen: v7x
topology: tpu7x:2x2x1
jax: 0.10.0
libtpu: 0.0.40
codegen_flags: <defaults>
</compile_context>

<pallas_src>
import math
import jax
import jax.numpy as jnp
from jax.experimental import pallas as pl
from jax.experimental.pallas import tpu as pltpu

# ---- model hyper-parameters (small, consistent with the module) -------------
B = 2              # batch
S = 8              # sequence length
H = 32             # hidden_size
NH = 4             # attention heads
DH = H // NH       # head dim
FF = 64            # feed-forward dim
L = 2              # num_blocks
VOCAB = 100        # vocab_size
MAX_POS = 32
NUM_SEG = 2
NUM_CLASSES = 3    # trainer.num_classes
CLS_PAD = 128      # lane-dense padded classifier width
NEG_INF = -1e9
LN_EPS = 1e-12


def _layernorm(x, gamma, beta):
    mu = jnp.mean(x, axis=-1, keepdims=True)
    var = jnp.mean((x - mu) ** 2, axis=-1, keepdims=True)
    return (x - mu) * jax.lax.rsqrt(var + LN_EPS) * gamma + beta


# --------------------- shared forward math (pure jnp) ------------------------
# Used both inside the Pallas kernel (on VMEM-loaded values) and by the pure
# JAX reference, so both paths run the exact same op sequence.
def _forward_math(x_emb, mask, embln, wqkv, bqkv, wo, w1, b1, w2, lvec, cw, cb):
    x = _layernorm(x_emb, embln[0:1, :], embln[1:2, :])

    # L=2: static Python unroll is fine.  TODO(synk): switch to lax.fori_loop
    # over the stacked (L, ...) leading axis if L ever grows (vreg pressure).
    for l in range(L):
        # ---- fused QKV projection: one (B*S,H) x (H,3H) matmul -------------
        qkv = jnp.dot(x, wqkv[l], preferred_element_type=jnp.float32) + bqkv[l]
        # split heads to a leading batch axis: (NH, B*S, DH)
        qh = jnp.stack([qkv[:, h * DH:(h + 1) * DH] for h in range(NH)], axis=0)
        kh = jnp.stack([qkv[:, H + h * DH:H + (h + 1) * DH] for h in range(NH)], axis=0)
        vh = jnp.stack([qkv[:, 2 * H + h * DH:2 * H + (h + 1) * DH] for h in range(NH)], axis=0)

        # ---- all-head, all-batch attention; cross-batch pairs masked out ----
        sc = jnp.einsum('hqd,hkd->hqk', qh, kh,
                        preferred_element_type=jnp.float32)        # (NH,BS,BS)
        sc = sc + mask[None, :, :]
        sc = sc - jnp.max(sc, axis=-1, keepdims=True)
        p = jnp.exp(sc)
        p = p / jnp.sum(p, axis=-1, keepdims=True)                 # exact norm
        ctx = jnp.einsum('hqk,hkd->hqd', p, vh,
                         preferred_element_type=jnp.float32)       # (NH,BS,DH)
        attn = jnp.concatenate([ctx[h] for h in range(NH)], axis=-1)  # (BS,H)

        # ---- output projection + residual + LN ------------------------------
        attn = jnp.dot(attn, wo[l], preferred_element_type=jnp.float32) + lvec[l, 0:1, :]
        x1 = _layernorm(x + attn, lvec[l, 1:2, :], lvec[l, 2:3, :])

        # ---- feed-forward ----------------------------------------------------
        hdn = jnp.dot(x1, w1[l], preferred_element_type=jnp.float32) + b1[l]
        # TODO(synk): tanh-approx GELU; nn.GELU() default is the erf form.
        hdn = jax.nn.gelu(hdn, approximate=True)
        ff = jnp.dot(hdn, w2[l], preferred_element_type=jnp.float32) + lvec[l, 3:4, :]
        x = _layernorm(x1 + ff, lvec[l, 4:5, :], lvec[l, 5:6, :])

    # ---- lane-dense classifier on all rows (CLS rows selected by wrapper) ---
    return jnp.dot(x, cw, preferred_element_type=jnp.float32) + cb   # (BS, 128)


# ------------------------------ fused kernel ---------------------------------
def _bert_kernel(x_ref, mask_ref, embln_ref,
                 wqkv_ref, bqkv_ref, wo_ref, w1_ref, b1_ref, w2_ref,
                 lvec_ref, cw_ref, cb_ref,
                 o_ref):
    o_ref[...] = _forward_math(
        x_ref[...], mask_ref[...], embln_ref[...],
        wqkv_ref[...], bqkv_ref[...], wo_ref[...],
        w1_ref[...], b1_ref[...], w2_ref[...],
        lvec_ref[...], cw_ref[...], cb_ref[...]).astype(o_ref.dtype)


# --------------------------- wrapper-side prep --------------------------------
def _prep_inputs(input_ids, segment_ids, kp):
    """Embedding gather (pure table lookups) + additive attention mask."""
    x_emb = (kp["tok_emb"][input_ids]
             + kp["pos_emb"][:S][None, :, :]
             + kp["seg_emb"][segment_ids]).reshape(B * S, H).astype(jnp.float32)
    # key-padding mask (pad id == 0) + cross-batch block mask, (B*S, B*S)
    key_pad = jnp.where(input_ids.reshape(1, B * S) == 0, NEG_INF, 0.0)
    rowb = jnp.repeat(jnp.arange(B), S)
    mask = (jnp.where(rowb[:, None] == rowb[None, :], 0.0, NEG_INF)
            .astype(jnp.float32) + key_pad)
    return x_emb, mask


def bert_forward(input_ids, segment_ids, kp):
    x_emb, mask = _prep_inputs(input_ids, segment_ids, kp)
    vmem = pl.BlockSpec(memory_space=pltpu.MemorySpace.VMEM)
    args = [x_emb, mask, kp["embln"], kp["wqkv"], kp["bqkv"], kp["wo"],
            kp["w1"], kp["b1"], kp["w2"], kp["lvec"], kp["cw"], kp["cb"]]
    out = pl.pallas_call(
        _bert_kernel,
        out_shape=jax.ShapeDtypeStruct((B * S, CLS_PAD), jnp.float32),
        in_specs=[vmem] * len(args),
        out_specs=vmem,
    )(*args)
    # CLS (position-0) token of each sequence, first NUM_CLASSES lanes
    return out.reshape(B, S, CLS_PAD)[:, 0, :NUM_CLASSES]


def bert_reference(input_ids, segment_ids, kp):
    x_emb, mask = _prep_inputs(input_ids, segment_ids, kp)
    out = _forward_math(x_emb, mask, kp["embln"], kp["wqkv"], kp["bqkv"],
                        kp["wo"], kp["w1"], kp["b1"], kp["w2"], kp["lvec"],
                        kp["cw"], kp["cb"])
    return out.reshape(B, S, CLS_PAD)[:, 0, :NUM_CLASSES]


# --------------------------- parameter construction --------------------------
def init_params(key):
    keys = iter(jax.random.split(key, 64))

    def dense(fan_in, fan_out):
        w = 0.02 * jax.random.normal(next(keys), (fan_in, fan_out), jnp.float32)
        b = jnp.zeros((1, fan_out), jnp.float32)
        return w, b

    params = {
        "tok_emb": 0.02 * jax.random.normal(next(keys), (VOCAB, H), jnp.float32),
        "pos_emb": 0.02 * jax.random.normal(next(keys), (MAX_POS, H), jnp.float32),
        "seg_emb": 0.02 * jax.random.normal(next(keys), (NUM_SEG, H), jnp.float32),
        "emb_gamma": jnp.ones((1, H), jnp.float32),
        "emb_beta": jnp.zeros((1, H), jnp.float32),
        "layers": [],
    }
    for _ in range(L):
        wq, bq = dense(H, H)
        wk, bk = dense(H, H)
        wv, bv = dense(H, H)
        wo, bo = dense(H, H)
        w1, b1 = dense(H, FF)
        w2, b2 = dense(FF, H)
        params["layers"].append(dict(
            wq=wq, bq=bq, wk=wk, bk=bk, wv=wv, bv=bv, wo=wo, bo=bo,
            g1=jnp.ones((1, H), jnp.float32), be1=jnp.zeros((1, H), jnp.float32),
            w1=w1, b1=b1, w2=w2, b2=b2,
            g2=jnp.ones((1, H), jnp.float32), be2=jnp.zeros((1, H), jnp.float32)))
    cw, cb = dense(H, NUM_CLASSES)
    params["cls_w"], params["cls_b"] = cw, cb
    return params


def prepare_params(params):
    """One-time wrapper-side re-layout (zero in-kernel cost):
       - fuse per-layer Q/K/V into one (H, 3H) weight / (1, 3H) bias with the
         1/sqrt(DH) score scale folded into the Q slice,
       - stack per-layer weights with a leading layer axis,
       - pack the small per-layer vectors into one (L, 6, H) tensor
         [bo, g1, be1, b2, g2, be2],
       - pad the classifier to 128 lanes so the kernel's only store is
         lane-dense / unmasked."""
    scale = 1.0 / math.sqrt(DH)
    layers = params["layers"]

    wqkv = jnp.stack([jnp.concatenate([lp["wq"] * scale, lp["wk"], lp["wv"]],
                                      axis=1) for lp in layers], axis=0)
    bqkv = jnp.stack([jnp.concatenate([lp["bq"] * scale, lp["bk"], lp["bv"]],
                                      axis=1) for lp in layers], axis=0)
    wo = jnp.stack([lp["wo"] for lp in layers], axis=0)
    w1 = jnp.stack([lp["w1"] for lp in layers], axis=0)
    b1 = jnp.stack([lp["b1"] for lp in layers], axis=0)
    w2 = jnp.stack([lp["w2"] for lp in layers], axis=0)
    lvec = jnp.stack([jnp.concatenate(
        [lp["bo"], lp["g1"], lp["be1"], lp["b2"], lp["g2"], lp["be2"]], axis=0)
        for lp in layers], axis=0)                                  # (L, 6, H)
    embln = jnp.concatenate([params["emb_gamma"], params["emb_beta"]], axis=0)

    cw_pad = jnp.zeros((H, CLS_PAD), jnp.float32).at[:, :NUM_CLASSES].set(params["cls_w"])
    cb_pad = jnp.zeros((1, CLS_PAD), jnp.float32).at[:, :NUM_CLASSES].set(params["cls_b"])

    return {
        "tok_emb": params["tok_emb"], "pos_emb": params["pos_emb"],
        "seg_emb": params["seg_emb"], "embln": embln,
        "wqkv": wqkv, "bqkv": bqkv, "wo": wo,
        "w1": w1, "b1": b1, "w2": w2, "lvec": lvec,
        "cw": cw_pad, "cb": cb_pad,
    }


if __name__ == "__main__":
    key = jax.random.PRNGKey(0)
    params = init_params(key)
    kp = prepare_params(params)

    kid = jax.random.fold_in(key, 999)
    input_ids = jax.random.randint(kid, (B, S), 1, VOCAB).astype(jnp.int32)
    input_ids = input_ids.at[1, S - 2:].set(0)              # pad tail of sample 1
    segment_ids = jnp.zeros((B, S), jnp.int32).at[:, S // 2:].set(1)

    logits = bert_forward(input_ids, segment_ids, kp)
    logits = jax.block_until_ready(logits)
    assert logits.shape == (B, NUM_CLASSES)
    assert bool(jnp.all(jnp.isfinite(logits)))

    # sanity check vs. an identical-math pure-JAX reference (lenient tolerance:
    # only matmul-precision / transcendental implementation differences remain)
    ref = jax.block_until_ready(bert_reference(input_ids, segment_ids, kp))
    assert bool(jnp.allclose(logits, ref, rtol=1e-1, atol=5e-2))

    print("KERNEL_OK")
</pallas_src>

<mosaic_0001>
module attributes {stable_mosaic.version = 11 : i64} {
  func.func @_bert_kernel(%arg0: memref<16x32xf32, #tpu.memory_space<vmem>>, %arg1: memref<16x16xf32, #tpu.memory_space<vmem>>, %arg2: memref<2x32xf32, #tpu.memory_space<vmem>>, %arg3: memref<2x32x96xf32, #tpu.memory_space<vmem>>, %arg4: memref<2x1x96xf32, #tpu.memory_space<vmem>>, %arg5: memref<2x32x32xf32, #tpu.memory_space<vmem>>, %arg6: memref<2x32x64xf32, #tpu.memory_space<vmem>>, %arg7: memref<2x1x64xf32, #tpu.memory_space<vmem>>, %arg8: memref<2x64x32xf32, #tpu.memory_space<vmem>>, %arg9: memref<2x6x32xf32, #tpu.memory_space<vmem>>, %arg10: memref<32x128xf32, #tpu.memory_space<vmem>>, %arg11: memref<1x128xf32, #tpu.memory_space<vmem>>, %arg12: memref<16x128xf32, #tpu.memory_space<vmem>>) attributes {dimension_semantics = [], scalar_prefetch = 0 : i64, scratch_operands = 0 : i64, tpu.core_type = #tpu.core_type<tc>} {
    %c0 = arith.constant 0 : index
    %c0_0 = arith.constant 0 : index
    %0 = vector.load %arg0[%c0, %c0_0] : memref<16x32xf32, #tpu.memory_space<vmem>>, vector<16x32xf32>
    %c0_1 = arith.constant 0 : index
    %c0_2 = arith.constant 0 : index
    %1 = vector.load %arg1[%c0_1, %c0_2] : memref<16x16xf32, #tpu.memory_space<vmem>>, vector<16x16xf32>
    %c0_3 = arith.constant 0 : index
    %c0_4 = arith.constant 0 : index
    %2 = vector.load %arg2[%c0_3, %c0_4] : memref<2x32xf32, #tpu.memory_space<vmem>>, vector<2x32xf32>
    %c0_5 = arith.constant 0 : index
    %c0_6 = arith.constant 0 : index
    %c0_7 = arith.constant 0 : index
    %3 = vector.load %arg3[%c0_5, %c0_6, %c0_7] : memref<2x32x96xf32, #tpu.memory_space<vmem>>, vector<2x32x96xf32>
    %c0_8 = arith.constant 0 : index
    %c0_9 = arith.constant 0 : index
    %c0_10 = arith.constant 0 : index
    %4 = vector.load %arg4[%c0_8, %c0_9, %c0_10] : memref<2x1x96xf32, #tpu.memory_space<vmem>>, vector<2x1x96xf32>
    %c0_11 = arith.constant 0 : index
    %c0_12 = arith.constant 0 : index
    %c0_13 = arith.constant 0 : index
    %5 = vector.load %arg5[%c0_11, %c0_12, %c0_13] : memref<2x32x32xf32, #tpu.memory_space<vmem>>, vector<2x32x32xf32>
    %c0_14 = arith.constant 0 : index
    %c0_15 = arith.constant 0 : index
    %c0_16 = arith.constant 0 : index
    %6 = vector.load %arg6[%c0_14, %c0_15, %c0_16] : memref<2x32x64xf32, #tpu.memory_space<vmem>>, vector<2x32x64xf32>
    %c0_17 = arith.constant 0 : index
    %c0_18 = arith.constant 0 : index
    %c0_19 = arith.constant 0 : index
    %7 = vector.load %arg7[%c0_17, %c0_18, %c0_19] : memref<2x1x64xf32, #tpu.memory_space<vmem>>, vector<2x1x64xf32>
    %c0_20 = arith.constant 0 : index
    %c0_21 = arith.constant 0 : index
    %c0_22 = arith.constant 0 : index
    %8 = vector.load %arg8[%c0_20, %c0_21, %c0_22] : memref<2x64x32xf32, #tpu.memory_space<vmem>>, vector<2x64x32xf32>
    %c0_23 = arith.constant 0 : index
    %c0_24 = arith.constant 0 : index
    %c0_25 = arith.constant 0 : index
    %9 = vector.load %arg9[%c0_23, %c0_24, %c0_25] : memref<2x6x32xf32, #tpu.memory_space<vmem>>, vector<2x6x32xf32>
    %c0_26 = arith.constant 0 : index
    %c0_27 = arith.constant 0 : index
    %10 = vector.load %arg10[%c0_26, %c0_27] : memref<32x128xf32, #tpu.memory_space<vmem>>, vector<32x128xf32>
    %c0_28 = arith.constant 0 : index
    %c0_29 = arith.constant 0 : index
    %11 = vector.load %arg11[%c0_28, %c0_29] : memref<1x128xf32, #tpu.memory_space<vmem>>, vector<1x128xf32>
    %12 = vector.extract_strided_slice %2 {offsets = [0, 0], sizes = [1, 32], strides = [1, 1]} : vector<2x32xf32> to vector<1x32xf32>
    %13 = vector.extract_strided_slice %2 {offsets = [1, 0], sizes = [1, 32], strides = [1, 1]} : vector<2x32xf32> to vector<1x32xf32>
    %cst = arith.constant dense<0.000000e+00> : vector<16xf32>
    %14 = vector.multi_reduction <add>, %0, %cst [1] : vector<16x32xf32> to vector<16xf32>
    %15 = vector.shape_cast %14 : vector<16xf32> to vector<16x1xf32>
    %cst_30 = arith.constant 3.200000e+01 : f32
    %16 = vector.broadcast %cst_30 : f32 to vector<16x1xf32>
    %17 = arith.divf %15, %16 : vector<16x1xf32>
    %18 = vector.broadcast %17 : vector<16x1xf32> to vector<16x32xf32>
    %19 = arith.subf %0, %18 : vector<16x32xf32>
    %20 = arith.mulf %19, %19 : vector<16x32xf32>
    %cst_31 = arith.constant dense<0.000000e+00> : vector<16xf32>
    %21 = vector.multi_reduction <add>, %20, %cst_31 [1] : vector<16x32xf32> to vector<16xf32>
    %22 = vector.shape_cast %21 : vector<16xf32> to vector<16x1xf32>
    %cst_32 = arith.constant 3.200000e+01 : f32
    %23 = vector.broadcast %cst_32 : f32 to vector<16x1xf32>
    %24 = arith.divf %22, %23 : vector<16x1xf32>
    %25 = vector.broadcast %17 : vector<16x1xf32> to vector<16x32xf32>
    %26 = arith.subf %0, %25 : vector<16x32xf32>
    %cst_33 = arith.constant 9.99999996E-13 : f32
    %27 = vector.broadcast %cst_33 : f32 to vector<16x1xf32>
    %28 = arith.addf %24, %27 : vector<16x1xf32>
    %29 = math.rsqrt %28 : vector<16x1xf32>
    %30 = vector.broadcast %29 : vector<16x1xf32> to vector<16x32xf32>
    %31 = arith.mulf %26, %30 : vector<16x32xf32>
    %32 = vector.broadcast %12 : vector<1x32xf32> to vector<16x32xf32>
    %33 = arith.mulf %31, %32 : vector<16x32xf32>
    %34 = vector.broadcast %13 : vector<1x32xf32> to vector<16x32xf32>
    %35 = arith.addf %33, %34 : vector<16x32xf32>
    %36 = vector.extract_strided_slice %3 {offsets = [0, 0, 0], sizes = [1, 32, 96], strides = [1, 1, 1]} : vector<2x32x96xf32> to vector<1x32x96xf32>
    %37 = vector.shape_cast %36 : vector<1x32x96xf32> to vector<32x96xf32>
    %cst_34 = arith.constant dense<0.000000e+00> : vector<16x96xf32>
    %38 = tpu.matmul %35, %37, %cst_34 {dimension_numbers = #tpu.dot_dimension_numbers<[1], [0], [0], [1], [0, 0, 1, 1], [], []>} : vector<16x32xf32>, vector<32x96xf32>, vector<16x96xf32> -> vector<16x96xf32>
    %39 = vector.extract_strided_slice %4 {offsets = [0, 0, 0], sizes = [1, 1, 96], strides = [1, 1, 1]} : vector<2x1x96xf32> to vector<1x1x96xf32>
    %40 = vector.shape_cast %39 : vector<1x1x96xf32> to vector<1x96xf32>
    %41 = vector.broadcast %40 : vector<1x96xf32> to vector<16x96xf32>
    %42 = arith.addf %38, %41 : vector<16x96xf32>
    %43 = vector.extract_strided_slice %42 {offsets = [0, 0], sizes = [16, 8], strides = [1, 1]} : vector<16x96xf32> to vector<16x8xf32>
    %44 = vector.extract_strided_slice %42 {offsets = [0, 8], sizes = [16, 8], strides = [1, 1]} : vector<16x96xf32> to vector<16x8xf32>
    %45 = vector.extract_strided_slice %42 {offsets = [0, 16], sizes = [16, 8], strides = [1, 1]} : vector<16x96xf32> to vector<16x8xf32>
    %46 = vector.extract_strided_slice %42 {offsets = [0, 24], sizes = [16, 8], strides = [1, 1]} : vector<16x96xf32> to vector<16x8xf32>
    %47 = vector.shape_cast %43 : vector<16x8xf32> to vector<1x16x8xf32>
    %48 = vector.shape_cast %44 : vector<16x8xf32> to vector<1x16x8xf32>
    %49 = vector.shape_cast %45 : vector<16x8xf32> to vector<1x16x8xf32>
    %50 = vector.shape_cast %46 : vector<16x8xf32> to vector<1x16x8xf32>
    %51 = tpu.concatenate %47, %48, %49, %50 in 0 : vector<1x16x8xf32>, vector<1x16x8xf32>, vector<1x16x8xf32>, vector<1x16x8xf32> -> vector<4x16x8xf32>
    %52 = vector.extract_strided_slice %42 {offsets = [0, 32], sizes = [16, 8], strides = [1, 1]} : vector<16x96xf32> to vector<16x8xf32>
    %53 = vector.extract_strided_slice %42 {offsets = [0, 40], sizes = [16, 8], strides = [1, 1]} : vector<16x96xf32> to vector<16x8xf32>
    %54 = vector.extract_strided_slice %42 {offsets = [0, 48], sizes = [16, 8], strides = [1, 1]} : vector<16x96xf32> to vector<16x8xf32>
    %55 = vector.extract_strided_slice %42 {offsets = [0, 56], sizes = [16, 8], strides = [1, 1]} : vector<16x96xf32> to vector<16x8xf32>
    %56 = vector.shape_cast %52 : vector<16x8xf32> to vector<1x16x8xf32>
    %57 = vector.shape_cast %53 : vector<16x8xf32> to vector<1x16x8xf32>
    %58 = vector.shape_cast %54 : vector<16x8xf32> to vector<1x16x8xf32>
    %59 = vector.shape_cast %55 : vector<16x8xf32> to vector<1x16x8xf32>
    %60 = tpu.concatenate %56, %57, %58, %59 in 0 : vector<1x16x8xf32>, vector<1x16x8xf32>, vector<1x16x8xf32>, vector<1x16x8xf32> -> vector<4x16x8xf32>
    %61 = vector.extract_strided_slice %42 {offsets = [0, 64], sizes = [16, 8], strides = [1, 1]} : vector<16x96xf32> to vector<16x8xf32>
    %62 = vector.extract_strided_slice %42 {offsets = [0, 72], sizes = [16, 8], strides = [1, 1]} : vector<16x96xf32> to vector<16x8xf32>
    %63 = vector.extract_strided_slice %42 {offsets = [0, 80], sizes = [16, 8], strides = [1, 1]} : vector<16x96xf32> to vector<16x8xf32>
    %64 = vector.extract_strided_slice %42 {offsets = [0, 88], sizes = [16, 8], strides = [1, 1]} : vector<16x96xf32> to vector<16x8xf32>
    %65 = vector.shape_cast %61 : vector<16x8xf32> to vector<1x16x8xf32>
    %66 = vector.shape_cast %62 : vector<16x8xf32> to vector<1x16x8xf32>
    %67 = vector.shape_cast %63 : vector<16x8xf32> to vector<1x16x8xf32>
    %68 = vector.shape_cast %64 : vector<16x8xf32> to vector<1x16x8xf32>
    %69 = tpu.concatenate %65, %66, %67, %68 in 0 : vector<1x16x8xf32>, vector<1x16x8xf32>, vector<1x16x8xf32>, vector<1x16x8xf32> -> vector<4x16x8xf32>
    "tpu.trace_start"() <{level = 10 : i32, message = "hqd,hkd->hqk"}> : () -> ()
    %cst_35 = arith.constant dense<0.000000e+00> : vector<4x16x16xf32>
    %70 = tpu.matmul %51, %60, %cst_35 {dimension_numbers = #tpu.dot_dimension_numbers<[2], [2], [1], [1], [0, 0, 0, 1, 1, 1], [0], [0]>} : vector<4x16x8xf32>, vector<4x16x8xf32>, vector<4x16x16xf32> -> vector<4x16x16xf32>
    "tpu.trace_stop"() : () -> ()
    %71 = vector.shape_cast %1 : vector<16x16xf32> to vector<1x16x16xf32>
    %72 = vector.broadcast %71 : vector<1x16x16xf32> to vector<4x16x16xf32>
    %73 = arith.addf %70, %72 : vector<4x16x16xf32>
    %cst_36 = arith.constant dense<0xFF800000> : vector<4x16xf32>
    %74 = vector.multi_reduction <maximumf>, %73, %cst_36 [2] : vector<4x16x16xf32> to vector<4x16xf32>
    %75 = vector.shape_cast %74 : vector<4x16xf32> to vector<4x16x1xf32>
    %76 = vector.broadcast %75 : vector<4x16x1xf32> to vector<4x16x16xf32>
    %77 = arith.subf %73, %76 : vector<4x16x16xf32>
    %78 = math.exp %77 : vector<4x16x16xf32>
    %cst_37 = arith.constant dense<0.000000e+00> : vector<4x16xf32>
    %79 = vector.multi_reduction <add>, %78, %cst_37 [2] : vector<4x16x16xf32> to vector<4x16xf32>
    %80 = vector.shape_cast %79 : vector<4x16xf32> to vector<4x16x1xf32>
    %81 = vector.broadcast %80 : vector<4x16x1xf32> to vector<4x16x16xf32>
    %82 = arith.divf %78, %81 : vector<4x16x16xf32>
    "tpu.trace_start"() <{level = 10 : i32, message = "hqk,hkd->hqd"}> : () -> ()
    %cst_38 = arith.constant dense<0.000000e+00> : vector<4x16x8xf32>
    %83 = tpu.matmul %82, %69, %cst_38 {dimension_numbers = #tpu.dot_dimension_numbers<[2], [1], [1], [2], [0, 0, 0, 1, 1, 2], [0], [0]>} : vector<4x16x16xf32>, vector<4x16x8xf32>, vector<4x16x8xf32> -> vector<4x16x8xf32>
    "tpu.trace_stop"() : () -> ()
    %84 = vector.extract_strided_slice %83 {offsets = [0, 0, 0], sizes = [1, 16, 8], strides = [1, 1, 1]} : vector<4x16x8xf32> to vector<1x16x8xf32>
    %85 = vector.shape_cast %84 : vector<1x16x8xf32> to vector<16x8xf32>
    %86 = vector.extract_strided_slice %83 {offsets = [1, 0, 0], sizes = [1, 16, 8], strides = [1, 1, 1]} : vector<4x16x8xf32> to vector<1x16x8xf32>
    %87 = vector.shape_cast %86 : vector<1x16x8xf32> to vector<16x8xf32>
    %88 = vector.extract_strided_slice %83 {offsets = [2, 0, 0], sizes = [1, 16, 8], strides = [1, 1, 1]} : vector<4x16x8xf32> to vector<1x16x8xf32>
    %89 = vector.shape_cast %88 : vector<1x16x8xf32> to vector<16x8xf32>
    %90 = vector.extract_strided_slice %83 {offsets = [3, 0, 0], sizes = [1, 16, 8], strides = [1, 1, 1]} : vector<4x16x8xf32> to vector<1x16x8xf32>
    %91 = vector.shape_cast %90 : vector<1x16x8xf32> to vector<16x8xf32>
    %92 = tpu.concatenate %85, %87, %89, %91 in 1 : vector<16x8xf32>, vector<16x8xf32>, vector<16x8xf32>, vector<16x8xf32> -> vector<16x32xf32>
    %93 = vector.extract_strided_slice %5 {offsets = [0, 0, 0], sizes = [1, 32, 32], strides = [1, 1, 1]} : vector<2x32x32xf32> to vector<1x32x32xf32>
    %94 = vector.shape_cast %93 : vector<1x32x32xf32> to vector<32x32xf32>
    %cst_39 = arith.constant dense<0.000000e+00> : vector<16x32xf32>
    %95 = tpu.matmul %92, %94, %cst_39 {dimension_numbers = #tpu.dot_dimension_numbers<[1], [0], [0], [1], [0, 0, 1, 1], [], []>} : vector<16x32xf32>, vector<32x32xf32>, vector<16x32xf32> -> vector<16x32xf32>
    %96 = vector.extract_strided_slice %9 {offsets = [0, 0, 0], sizes = [1, 1, 32], strides = [1, 1, 1]} : vector<2x6x32xf32> to vector<1x1x32xf32>
    %97 = vector.shape_cast %96 : vector<1x1x32xf32> to vector<1x32xf32>
    %98 = vector.broadcast %97 : vector<1x32xf32> to vector<16x32xf32>
    %99 = arith.addf %95, %98 : vector<16x32xf32>
    %100 = arith.addf %35, %99 : vector<16x32xf32>
    %101 = vector.extract_strided_slice %9 {offsets = [0, 1, 0], sizes = [1, 1, 32], strides = [1, 1, 1]} : vector<2x6x32xf32> to vector<1x1x32xf32>
    %102 = vector.shape_cast %101 : vector<1x1x32xf32> to vector<1x32xf32>
    %103 = vector.extract_strided_slice %9 {offsets = [0, 2, 0], sizes = [1, 1, 32], strides = [1, 1, 1]} : vector<2x6x32xf32> to vector<1x1x32xf32>
    %104 = vector.shape_cast %103 : vector<1x1x32xf32> to vector<1x32xf32>
    %cst_40 = arith.constant dense<0.000000e+00> : vector<16xf32>
    %105 = vector.multi_reduction <add>, %100, %cst_40 [1] : vector<16x32xf32> to vector<16xf32>
    %106 = vector.shape_cast %105 : vector<16xf32> to vector<16x1xf32>
    %cst_41 = arith.constant 3.200000e+01 : f32
    %107 = vector.broadcast %cst_41 : f32 to vector<16x1xf32>
    %108 = arith.divf %106, %107 : vector<16x1xf32>
    %109 = vector.broadcast %108 : vector<16x1xf32> to vector<16x32xf32>
    %110 = arith.subf %100, %109 : vector<16x32xf32>
    %111 = arith.mulf %110, %110 : vector<16x32xf32>
    %cst_42 = arith.constant dense<0.000000e+00> : vector<16xf32>
    %112 = vector.multi_reduction <add>, %111, %cst_42 [1] : vector<16x32xf32> to vector<16xf32>
    %113 = vector.shape_cast %112 : vector<16xf32> to vector<16x1xf32>
    %cst_43 = arith.constant 3.200000e+01 : f32
    %114 = vector.broadcast %cst_43 : f32 to vector<16x1xf32>
    %115 = arith.divf %113, %114 : vector<16x1xf32>
    %116 = vector.broadcast %108 : vector<16x1xf32> to vector<16x32xf32>
    %117 = arith.subf %100, %116 : vector<16x32xf32>
    %cst_44 = arith.constant 9.99999996E-13 : f32
    %118 = vector.broadcast %cst_44 : f32 to vector<16x1xf32>
    %119 = arith.addf %115, %118 : vector<16x1xf32>
    %120 = math.rsqrt %119 : vector<16x1xf32>
    %121 = vector.broadcast %120 : vector<16x1xf32> to vector<16x32xf32>
    %122 = arith.mulf %117, %121 : vector<16x32xf32>
    %123 = vector.broadcast %102 : vector<1x32xf32> to vector<16x32xf32>
    %124 = arith.mulf %122, %123 : vector<16x32xf32>
    %125 = vector.broadcast %104 : vector<1x32xf32> to vector<16x32xf32>
    %126 = arith.addf %124, %125 : vector<16x32xf32>
    %127 = vector.extract_strided_slice %6 {offsets = [0, 0, 0], sizes = [1, 32, 64], strides = [1, 1, 1]} : vector<2x32x64xf32> to vector<1x32x64xf32>
    %128 = vector.shape_cast %127 : vector<1x32x64xf32> to vector<32x64xf32>
    %cst_45 = arith.constant dense<0.000000e+00> : vector<16x64xf32>
    %129 = tpu.matmul %126, %128, %cst_45 {dimension_numbers = #tpu.dot_dimension_numbers<[1], [0], [0], [1], [0, 0, 1, 1], [], []>} : vector<16x32xf32>, vector<32x64xf32>, vector<16x64xf32> -> vector<16x64xf32>
    %130 = vector.extract_strided_slice %7 {offsets = [0, 0, 0], sizes = [1, 1, 64], strides = [1, 1, 1]} : vector<2x1x64xf32> to vector<1x1x64xf32>
    %131 = vector.shape_cast %130 : vector<1x1x64xf32> to vector<1x64xf32>
    %132 = vector.broadcast %131 : vector<1x64xf32> to vector<16x64xf32>
    %133 = arith.addf %129, %132 : vector<16x64xf32>
    %134 = arith.mulf %133, %133 : vector<16x64xf32>
    %135 = arith.mulf %133, %134 : vector<16x64xf32>
    %cst_46 = arith.constant 4.471500e-02 : f32
    %136 = vector.broadcast %cst_46 : f32 to vector<16x64xf32>
    %137 = arith.mulf %136, %135 : vector<16x64xf32>
    %138 = arith.addf %133, %137 : vector<16x64xf32>
    %cst_47 = arith.constant 0.797884583 : f32
    %139 = vector.broadcast %cst_47 : f32 to vector<16x64xf32>
    %140 = arith.mulf %139, %138 : vector<16x64xf32>
    %141 = math.tanh %140 : vector<16x64xf32>
    %cst_48 = arith.constant 1.000000e+00 : f32
    %142 = vector.broadcast %cst_48 : f32 to vector<16x64xf32>
    %143 = arith.addf %142, %141 : vector<16x64xf32>
    %cst_49 = arith.constant 5.000000e-01 : f32
    %144 = vector.broadcast %cst_49 : f32 to vector<16x64xf32>
    %145 = arith.mulf %144, %143 : vector<16x64xf32>
    %146 = arith.mulf %133, %145 : vector<16x64xf32>
    %147 = vector.extract_strided_slice %8 {offsets = [0, 0, 0], sizes = [1, 64, 32], strides = [1, 1, 1]} : vector<2x64x32xf32> to vector<1x64x32xf32>
    %148 = vector.shape_cast %147 : vector<1x64x32xf32> to vector<64x32xf32>
    %cst_50 = arith.constant dense<0.000000e+00> : vector<16x32xf32>
    %149 = tpu.matmul %146, %148, %cst_50 {dimension_numbers = #tpu.dot_dimension_numbers<[1], [0], [0], [1], [0, 0, 1, 1], [], []>} : vector<16x64xf32>, vector<64x32xf32>, vector<16x32xf32> -> vector<16x32xf32>
    %150 = vector.extract_strided_slice %9 {offsets = [0, 3, 0], sizes = [1, 1, 32], strides = [1, 1, 1]} : vector<2x6x32xf32> to vector<1x1x32xf32>
    %151 = vector.shape_cast %150 : vector<1x1x32xf32> to vector<1x32xf32>
    %152 = vector.broadcast %151 : vector<1x32xf32> to vector<16x32xf32>
    %153 = arith.addf %149, %152 : vector<16x32xf32>
    %154 = arith.addf %126, %153 : vector<16x32xf32>
    %155 = vector.extract_strided_slice %9 {offsets = [0, 4, 0], sizes = [1, 1, 32], strides = [1, 1, 1]} : vector<2x6x32xf32> to vector<1x1x32xf32>
    %156 = vector.shape_cast %155 : vector<1x1x32xf32> to vector<1x32xf32>
    %157 = vector.extract_strided_slice %9 {offsets = [0, 5, 0], sizes = [1, 1, 32], strides = [1, 1, 1]} : vector<2x6x32xf32> to vector<1x1x32xf32>
    %158 = vector.shape_cast %157 : vector<1x1x32xf32> to vector<1x32xf32>
    %cst_51 = arith.constant dense<0.000000e+00> : vector<16xf32>
    %159 = vector.multi_reduction <add>, %154, %cst_51 [1] : vector<16x32xf32> to vector<16xf32>
    %160 = vector.shape_cast %159 : vector<16xf32> to vector<16x1xf32>
    %cst_52 = arith.constant 3.200000e+01 : f32
    %161 = vector.broadcast %cst_52 : f32 to vector<16x1xf32>
    %162 = arith.divf %160, %161 : vector<16x1xf32>
    %163 = vector.broadcast %162 : vector<16x1xf32> to vector<16x32xf32>
    %164 = arith.subf %154, %163 : vector<16x32xf32>
    %165 = arith.mulf %164, %164 : vector<16x32xf32>
    %cst_53 = arith.constant dense<0.000000e+00> : vector<16xf32>
    %166 = vector.multi_reduction <add>, %165, %cst_53 [1] : vector<16x32xf32> to vector<16xf32>
    %167 = vector.shape_cast %166 : vector<16xf32> to vector<16x1xf32>
    %cst_54 = arith.constant 3.200000e+01 : f32
    %168 = vector.broadcast %cst_54 : f32 to vector<16x1xf32>
    %169 = arith.divf %167, %168 : vector<16x1xf32>
    %170 = vector.broadcast %162 : vector<16x1xf32> to vector<16x32xf32>
    %171 = arith.subf %154, %170 : vector<16x32xf32>
    %cst_55 = arith.constant 9.99999996E-13 : f32
    %172 = vector.broadcast %cst_55 : f32 to vector<16x1xf32>
    %173 = arith.addf %169, %172 : vector<16x1xf32>
    %174 = math.rsqrt %173 : vector<16x1xf32>
    %175 = vector.broadcast %174 : vector<16x1xf32> to vector<16x32xf32>
    %176 = arith.mulf %171, %175 : vector<16x32xf32>
    %177 = vector.broadcast %156 : vector<1x32xf32> to vector<16x32xf32>
    %178 = arith.mulf %176, %177 : vector<16x32xf32>
    %179 = vector.broadcast %158 : vector<1x32xf32> to vector<16x32xf32>
    %180 = arith.addf %178, %179 : vector<16x32xf32>
    %181 = vector.extract_strided_slice %3 {offsets = [1, 0, 0], sizes = [1, 32, 96], strides = [1, 1, 1]} : vector<2x32x96xf32> to vector<1x32x96xf32>
    %182 = vector.shape_cast %181 : vector<1x32x96xf32> to vector<32x96xf32>
    %cst_56 = arith.constant dense<0.000000e+00> : vector<16x96xf32>
    %183 = tpu.matmul %180, %182, %cst_56 {dimension_numbers = #tpu.dot_dimension_numbers<[1], [0], [0], [1], [0, 0, 1, 1], [], []>} : vector<16x32xf32>, vector<32x96xf32>, vector<16x96xf32> -> vector<16x96xf32>
    %184 = vector.extract_strided_slice %4 {offsets = [1, 0, 0], sizes = [1, 1, 96], strides = [1, 1, 1]} : vector<2x1x96xf32> to vector<1x1x96xf32>
    %185 = vector.shape_cast %184 : vector<1x1x96xf32> to vector<1x96xf32>
    %186 = vector.broadcast %185 : vector<1x96xf32> to vector<16x96xf32>
    %187 = arith.addf %183, %186 : vector<16x96xf32>
    %188 = vector.extract_strided_slice %187 {offsets = [0, 0], sizes = [16, 8], strides = [1, 1]} : vector<16x96xf32> to vector<16x8xf32>
    %189 = vector.extract_strided_slice %187 {offsets = [0, 8], sizes = [16, 8], strides = [1, 1]} : vector<16x96xf32> to vector<16x8xf32>
    %190 = vector.extract_strided_slice %187 {offsets = [0, 16], sizes = [16, 8], strides = [1, 1]} : vector<16x96xf32> to vector<16x8xf32>
    %191 = vector.extract_strided_slice %187 {offsets = [0, 24], sizes = [16, 8], strides = [1, 1]} : vector<16x96xf32> to vector<16x8xf32>
    %192 = vector.shape_cast %188 : vector<16x8xf32> to vector<1x16x8xf32>
    %193 = vector.shape_cast %189 : vector<16x8xf32> to vector<1x16x8xf32>
    %194 = vector.shape_cast %190 : vector<16x8xf32> to vector<1x16x8xf32>
    %195 = vector.shape_cast %191 : vector<16x8xf32> to vector<1x16x8xf32>
    %196 = tpu.concatenate %192, %193, %194, %195 in 0 : vector<1x16x8xf32>, vector<1x16x8xf32>, vector<1x16x8xf32>, vector<1x16x8xf32> -> vector<4x16x8xf32>
    %197 = vector.extract_strided_slice %187 {offsets = [0, 32], sizes = [16, 8], strides = [1, 1]} : vector<16x96xf32> to vector<16x8xf32>
    %198 = vector.extract_strided_slice %187 {offsets = [0, 40], sizes = [16, 8], strides = [1, 1]} : vector<16x96xf32> to vector<16x8xf32>
    %199 = vector.extract_strided_slice %187 {offsets = [0, 48], sizes = [16, 8], strides = [1, 1]} : vector<16x96xf32> to vector<16x8xf32>
    %200 = vector.extract_strided_slice %187 {offsets = [0, 56], sizes = [16, 8], strides = [1, 1]} : vector<16x96xf32> to vector<16x8xf32>
    %201 = vector.shape_cast %197 : vector<16x8xf32> to vector<1x16x8xf32>
    %202 = vector.shape_cast %198 : vector<16x8xf32> to vector<1x16x8xf32>
    %203 = vector.shape_cast %199 : vector<16x8xf32> to vector<1x16x8xf32>
    %204 = vector.shape_cast %200 : vector<16x8xf32> to vector<1x16x8xf32>
    %205 = tpu.concatenate %201, %202, %203, %204 in 0 : vector<1x16x8xf32>, vector<1x16x8xf32>, vector<1x16x8xf32>, vector<1x16x8xf32> -> vector<4x16x8xf32>
    %206 = vector.extract_strided_slice %187 {offsets = [0, 64], sizes = [16, 8], strides = [1, 1]} : vector<16x96xf32> to vector<16x8xf32>
    %207 = vector.extract_strided_slice %187 {offsets = [0, 72], sizes = [16, 8], strides = [1, 1]} : vector<16x96xf32> to vector<16x8xf32>
    %208 = vector.extract_strided_slice %187 {offsets = [0, 80], sizes = [16, 8], strides = [1, 1]} : vector<16x96xf32> to vector<16x8xf32>
    %209 = vector.extract_strided_slice %187 {offsets = [0, 88], sizes = [16, 8], strides = [1, 1]} : vector<16x96xf32> to vector<16x8xf32>
    %210 = vector.shape_cast %206 : vector<16x8xf32> to vector<1x16x8xf32>
    %211 = vector.shape_cast %207 : vector<16x8xf32> to vector<1x16x8xf32>
    %212 = vector.shape_cast %208 : vector<16x8xf32> to vector<1x16x8xf32>
    %213 = vector.shape_cast %209 : vector<16x8xf32> to vector<1x16x8xf32>
    %214 = tpu.concatenate %210, %211, %212, %213 in 0 : vector<1x16x8xf32>, vector<1x16x8xf32>, vector<1x16x8xf32>, vector<1x16x8xf32> -> vector<4x16x8xf32>
    "tpu.trace_start"() <{level = 10 : i32, message = "hqd,hkd->hqk"}> : () -> ()
    %cst_57 = arith.constant dense<0.000000e+00> : vector<4x16x16xf32>
    %215 = tpu.matmul %196, %205, %cst_57 {dimension_numbers = #tpu.dot_dimension_numbers<[2], [2], [1], [1], [0, 0, 0, 1, 1, 1], [0], [0]>} : vector<4x16x8xf32>, vector<4x16x8xf32>, vector<4x16x16xf32> -> vector<4x16x16xf32>
    "tpu.trace_stop"() : () -> ()
    %216 = vector.shape_cast %1 : vector<16x16xf32> to vector<1x16x16xf32>
    %217 = vector.broadcast %216 : vector<1x16x16xf32> to vector<4x16x16xf32>
    %218 = arith.addf %215, %217 : vector<4x16x16xf32>
    %cst_58 = arith.constant dense<0xFF800000> : vector<4x16xf32>
    %219 = vector.multi_reduction <maximumf>, %218, %cst_58 [2] : vector<4x16x16xf32> to vector<4x16xf32>
    %220 = vector.shape_cast %219 : vector<4x16xf32> to vector<4x16x1xf32>
    %221 = vector.broadcast %220 : vector<4x16x1xf32> to vector<4x16x16xf32>
    %222 = arith.subf %218, %221 : vector<4x16x16xf32>
    %223 = math.exp %222 : vector<4x16x16xf32>
    %cst_59 = arith.constant dense<0.000000e+00> : vector<4x16xf32>
    %224 = vector.multi_reduction <add>, %223, %cst_59 [2] : vector<4x16x16xf32> to vector<4x16xf32>
    %225 = vector.shape_cast %224 : vector<4x16xf32> to vector<4x16x1xf32>
    %226 = vector.broadcast %225 : vector<4x16x1xf32> to vector<4x16x16xf32>
    %227 = arith.divf %223, %226 : vector<4x16x16xf32>
    "tpu.trace_start"() <{level = 10 : i32, message = "hqk,hkd->hqd"}> : () -> ()
    %cst_60 = arith.constant dense<0.000000e+00> : vector<4x16x8xf32>
    %228 = tpu.matmul %227, %214, %cst_60 {dimension_numbers = #tpu.dot_dimension_numbers<[2], [1], [1], [2], [0, 0, 0, 1, 1, 2], [0], [0]>} : vector<4x16x16xf32>, vector<4x16x8xf32>, vector<4x16x8xf32> -> vector<4x16x8xf32>
    "tpu.trace_stop"() : () -> ()
    %229 = vector.extract_strided_slice %228 {offsets = [0, 0, 0], sizes = [1, 16, 8], strides = [1, 1, 1]} : vector<4x16x8xf32> to vector<1x16x8xf32>
    %230 = vector.shape_cast %229 : vector<1x16x8xf32> to vector<16x8xf32>
    %231 = vector.extract_strided_slice %228 {offsets = [1, 0, 0], sizes = [1, 16, 8], strides = [1, 1, 1]} : vector<4x16x8xf32> to vector<1x16x8xf32>
    %232 = vector.shape_cast %231 : vector<1x16x8xf32> to vector<16x8xf32>
    %233 = vector.extract_strided_slice %228 {offsets = [2, 0, 0], sizes = [1, 16, 8], strides = [1, 1, 1]} : vector<4x16x8xf32> to vector<1x16x8xf32>
    %234 = vector.shape_cast %233 : vector<1x16x8xf32> to vector<16x8xf32>
    %235 = vector.extract_strided_slice %228 {offsets = [3, 0, 0], sizes = [1, 16, 8], strides = [1, 1, 1]} : vector<4x16x8xf32> to vector<1x16x8xf32>
    %236 = vector.shape_cast %235 : vector<1x16x8xf32> to vector<16x8xf32>
    %237 = tpu.concatenate %230, %232, %234, %236 in 1 : vector<16x8xf32>, vector<16x8xf32>, vector<16x8xf32>, vector<16x8xf32> -> vector<16x32xf32>
    %238 = vector.extract_strided_slice %5 {offsets = [1, 0, 0], sizes = [1, 32, 32], strides = [1, 1, 1]} : vector<2x32x32xf32> to vector<1x32x32xf32>
    %239 = vector.shape_cast %238 : vector<1x32x32xf32> to vector<32x32xf32>
    %cst_61 = arith.constant dense<0.000000e+00> : vector<16x32xf32>
    %240 = tpu.matmul %237, %239, %cst_61 {dimension_numbers = #tpu.dot_dimension_numbers<[1], [0], [0], [1], [0, 0, 1, 1], [], []>} : vector<16x32xf32>, vector<32x32xf32>, vector<16x32xf32> -> vector<16x32xf32>
    %241 = vector.extract_strided_slice %9 {offsets = [1, 0, 0], sizes = [1, 1, 32], strides = [1, 1, 1]} : vector<2x6x32xf32> to vector<1x1x32xf32>
    %242 = vector.shape_cast %241 : vector<1x1x32xf32> to vector<1x32xf32>
    %243 = vector.broadcast %242 : vector<1x32xf32> to vector<16x32xf32>
    %244 = arith.addf %240, %243 : vector<16x32xf32>
    %245 = arith.addf %180, %244 : vector<16x32xf32>
    %246 = vector.extract_strided_slice %9 {offsets = [1, 1, 0], sizes = [1, 1, 32], strides = [1, 1, 1]} : vector<2x6x32xf32> to vector<1x1x32xf32>
    %247 = vector.shape_cast %246 : vector<1x1x32xf32> to vector<1x32xf32>
    %248 = vector.extract_strided_slice %9 {offsets = [1, 2, 0], sizes = [1, 1, 32], strides = [1, 1, 1]} : vector<2x6x32xf32> to vector<1x1x32xf32>
    %249 = vector.shape_cast %248 : vector<1x1x32xf32> to vector<1x32xf32>
    %cst_62 = arith.constant dense<0.000000e+00> : vector<16xf32>
    %250 = vector.multi_reduction <add>, %245, %cst_62 [1] : vector<16x32xf32> to vector<16xf32>
    %251 = vector.shape_cast %250 : vector<16xf32> to vector<16x1xf32>
    %cst_63 = arith.constant 3.200000e+01 : f32
    %252 = vector.broadcast %cst_63 : f32 to vector<16x1xf32>
    %253 = arith.divf %251, %252 : vector<16x1xf32>
    %254 = vector.broadcast %253 : vector<16x1xf32> to vector<16x32xf32>
    %255 = arith.subf %245, %254 : vector<16x32xf32>
    %256 = arith.mulf %255, %255 : vector<16x32xf32>
    %cst_64 = arith.constant dense<0.000000e+00> : vector<16xf32>
    %257 = vector.multi_reduction <add>, %256, %cst_64 [1] : vector<16x32xf32> to vector<16xf32>
    %258 = vector.shape_cast %257 : vector<16xf32> to vector<16x1xf32>
    %cst_65 = arith.constant 3.200000e+01 : f32
    %259 = vector.broadcast %cst_65 : f32 to vector<16x1xf32>
    %260 = arith.divf %258, %259 : vector<16x1xf32>
    %261 = vector.broadcast %253 : vector<16x1xf32> to vector<16x32xf32>
    %262 = arith.subf %245, %261 : vector<16x32xf32>
    %cst_66 = arith.constant 9.99999996E-13 : f32
    %263 = vector.broadcast %cst_66 : f32 to vector<16x1xf32>
    %264 = arith.addf %260, %263 : vector<16x1xf32>
    %265 = math.rsqrt %264 : vector<16x1xf32>
    %266 = vector.broadcast %265 : vector<16x1xf32> to vector<16x32xf32>
    %267 = arith.mulf %262, %266 : vector<16x32xf32>
    %268 = vector.broadcast %247 : vector<1x32xf32> to vector<16x32xf32>
    %269 = arith.mulf %267, %268 : vector<16x32xf32>
    %270 = vector.broadcast %249 : vector<1x32xf32> to vector<16x32xf32>
    %271 = arith.addf %269, %270 : vector<16x32xf32>
    %272 = vector.extract_strided_slice %6 {offsets = [1, 0, 0], sizes = [1, 32, 64], strides = [1, 1, 1]} : vector<2x32x64xf32> to vector<1x32x64xf32>
    %273 = vector.shape_cast %272 : vector<1x32x64xf32> to vector<32x64xf32>
    %cst_67 = arith.constant dense<0.000000e+00> : vector<16x64xf32>
    %274 = tpu.matmul %271, %273, %cst_67 {dimension_numbers = #tpu.dot_dimension_numbers<[1], [0], [0], [1], [0, 0, 1, 1], [], []>} : vector<16x32xf32>, vector<32x64xf32>, vector<16x64xf32> -> vector<16x64xf32>
    %275 = vector.extract_strided_slice %7 {offsets = [1, 0, 0], sizes = [1, 1, 64], strides = [1, 1, 1]} : vector<2x1x64xf32> to vector<1x1x64xf32>
    %276 = vector.shape_cast %275 : vector<1x1x64xf32> to vector<1x64xf32>
    %277 = vector.broadcast %276 : vector<1x64xf32> to vector<16x64xf32>
    %278 = arith.addf %274, %277 : vector<16x64xf32>
    %279 = arith.mulf %278, %278 : vector<16x64xf32>
    %280 = arith.mulf %278, %279 : vector<16x64xf32>
    %cst_68 = arith.constant 4.471500e-02 : f32
    %281 = vector.broadcast %cst_68 : f32 to vector<16x64xf32>
    %282 = arith.mulf %281, %280 : vector<16x64xf32>
    %283 = arith.addf %278, %282 : vector<16x64xf32>
    %cst_69 = arith.constant 0.797884583 : f32
    %284 = vector.broadcast %cst_69 : f32 to vector<16x64xf32>
    %285 = arith.mulf %284, %283 : vector<16x64xf32>
    %286 = math.tanh %285 : vector<16x64xf32>
    %cst_70 = arith.constant 1.000000e+00 : f32
    %287 = vector.broadcast %cst_70 : f32 to vector<16x64xf32>
    %288 = arith.addf %287, %286 : vector<16x64xf32>
    %cst_71 = arith.constant 5.000000e-01 : f32
    %289 = vector.broadcast %cst_71 : f32 to vector<16x64xf32>
    %290 = arith.mulf %289, %288 : vector<16x64xf32>
    %291 = arith.mulf %278, %290 : vector<16x64xf32>
    %292 = vector.extract_strided_slice %8 {offsets = [1, 0, 0], sizes = [1, 64, 32], strides = [1, 1, 1]} : vector<2x64x32xf32> to vector<1x64x32xf32>
    %293 = vector.shape_cast %292 : vector<1x64x32xf32> to vector<64x32xf32>
    %cst_72 = arith.constant dense<0.000000e+00> : vector<16x32xf32>
    %294 = tpu.matmul %291, %293, %cst_72 {dimension_numbers = #tpu.dot_dimension_numbers<[1], [0], [0], [1], [0, 0, 1, 1], [], []>} : vector<16x64xf32>, vector<64x32xf32>, vector<16x32xf32> -> vector<16x32xf32>
    %295 = vector.extract_strided_slice %9 {offsets = [1, 3, 0], sizes = [1, 1, 32], strides = [1, 1, 1]} : vector<2x6x32xf32> to vector<1x1x32xf32>
    %296 = vector.shape_cast %295 : vector<1x1x32xf32> to vector<1x32xf32>
    %297 = vector.broadcast %296 : vector<1x32xf32> to vector<16x32xf32>
    %298 = arith.addf %294, %297 : vector<16x32xf32>
    %299 = arith.addf %271, %298 : vector<16x32xf32>
    %300 = vector.extract_strided_slice %9 {offsets = [1, 4, 0], sizes = [1, 1, 32], strides = [1, 1, 1]} : vector<2x6x32xf32> to vector<1x1x32xf32>
    %301 = vector.shape_cast %300 : vector<1x1x32xf32> to vector<1x32xf32>
    %302 = vector.extract_strided_slice %9 {offsets = [1, 5, 0], sizes = [1, 1, 32], strides = [1, 1, 1]} : vector<2x6x32xf32> to vector<1x1x32xf32>
    %303 = vector.shape_cast %302 : vector<1x1x32xf32> to vector<1x32xf32>
    %cst_73 = arith.constant dense<0.000000e+00> : vector<16xf32>
    %304 = vector.multi_reduction <add>, %299, %cst_73 [1] : vector<16x32xf32> to vector<16xf32>
    %305 = vector.shape_cast %304 : vector<16xf32> to vector<16x1xf32>
    %cst_74 = arith.constant 3.200000e+01 : f32
    %306 = vector.broadcast %cst_74 : f32 to vector<16x1xf32>
    %307 = arith.divf %305, %306 : vector<16x1xf32>
    %308 = vector.broadcast %307 : vector<16x1xf32> to vector<16x32xf32>
    %309 = arith.subf %299, %308 : vector<16x32xf32>
    %310 = arith.mulf %309, %309 : vector<16x32xf32>
    %cst_75 = arith.constant dense<0.000000e+00> : vector<16xf32>
    %311 = vector.multi_reduction <add>, %310, %cst_75 [1] : vector<16x32xf32> to vector<16xf32>
    %312 = vector.shape_cast %311 : vector<16xf32> to vector<16x1xf32>
    %cst_76 = arith.constant 3.200000e+01 : f32
    %313 = vector.broadcast %cst_76 : f32 to vector<16x1xf32>
    %314 = arith.divf %312, %313 : vector<16x1xf32>
    %315 = vector.broadcast %307 : vector<16x1xf32> to vector<16x32xf32>
    %316 = arith.subf %299, %315 : vector<16x32xf32>
    %cst_77 = arith.constant 9.99999996E-13 : f32
    %317 = vector.broadcast %cst_77 : f32 to vector<16x1xf32>
    %318 = arith.addf %314, %317 : vector<16x1xf32>
    %319 = math.rsqrt %318 : vector<16x1xf32>
    %320 = vector.broadcast %319 : vector<16x1xf32> to vector<16x32xf32>
    %321 = arith.mulf %316, %320 : vector<16x32xf32>
    %322 = vector.broadcast %301 : vector<1x32xf32> to vector<16x32xf32>
    %323 = arith.mulf %321, %322 : vector<16x32xf32>
    %324 = vector.broadcast %303 : vector<1x32xf32> to vector<16x32xf32>
    %325 = arith.addf %323, %324 : vector<16x32xf32>
    %cst_78 = arith.constant dense<0.000000e+00> : vector<16x128xf32>
    %326 = tpu.matmul %325, %10, %cst_78 {dimension_numbers = #tpu.dot_dimension_numbers<[1], [0], [0], [1], [0, 0, 1, 1], [], []>} : vector<16x32xf32>, vector<32x128xf32>, vector<16x128xf32> -> vector<16x128xf32>
    %327 = vector.broadcast %11 : vector<1x128xf32> to vector<16x128xf32>
    %328 = arith.addf %326, %327 : vector<16x128xf32>
    %c0_79 = arith.constant 0 : index
    %c0_80 = arith.constant 0 : index
    %329 = vector.load %arg12[%c0_79, %c0_80] : memref<16x128xf32, #tpu.memory_space<vmem>>, vector<16x128xf32>
    tpu.vector_store %arg12[%c0_79, %c0_80], %328 {strides = array<i32>} : memref<16x128xf32, #tpu.memory_space<vmem>>, vector<16x128xf32>,
    return
  }
}

</mosaic_0001>

<bundles_post_ra>
// kernel: tpu_custom_call.1
= control target key start
LH: loop header
LB: loop body
LE: loop exit
PB: predicated region body
PF: predicated region fallthrough
CT: control target
= control target key end

     0   :  { %17 = vsyncpa [#allocation3], 0  ;;  %s4301_s0 = inlined_call_operand.hbm [shape: f32[16,32], index: 0, kind: input, shape index: {}]   ;;  %s4302_s1 = inlined_call_operand.hbm [shape: f32[16,16], index: 1, kind: input, shape index: {}]   ;;  %s4303_s2 = inlined_call_operand.vmem [shape: f32[2,32], index: 2, kind: input, shape index: {}]   ;;  %s4304_s3 = inlined_call_operand.vmem [shape: f32[2,32,96], index: 3, kind: input, shape index: {}]   ;;  %s4305_s4 = inlined_call_operand.vmem [shape: f32[2,1,96], index: 4, kind: input, shape index: {}]   ;;  %s4306_s5 = inlined_call_operand.vmem [shape: f32[2,32,32], index: 5, kind: input, shape index: {}]   ;;  %s4307_s6 = inlined_call_operand.vmem [shape: f32[2,32,64], index: 6, kind: input, shape index: {}]   ;;  %s4308_s7 = inlined_call_operand.vmem [shape: f32[2,1,64], index: 7, kind: input, shape index: {}]   ;;  %s4309_s8 = inlined_call_operand.vmem [shape: f32[2,64,32], index: 8, kind: input, shape index: {}]   ;;  %s4310_s9 = inlined_call_operand.vmem [shape: f32[2,6,32], index: 9, kind: input, shape index: {}]   ;;  %s4311_s10 = inlined_call_operand.vmem [shape: f32[32,128], index: 10, kind: input, shape index: {}]   ;;  %s4312_s11 = inlined_call_operand.vmem [shape: f32[1,128], index: 11, kind: input, shape index: {}]   ;;  %s4313_s12 = inlined_call_operand.hbm [shape: f32[16,128], index: 12, kind: output, shape index: {}]  }
   0x1   :  { %18 = vsyncpa [#allocation6], 0 }
   0x2   :  { %19 = vsyncpa [#allocation4], 0  ;;  %s3665_s21 = smov [#allocation2]   ;;  %s3593_s25 = scalar_lea.hbm %s4301_s0, 256 }
   0x3   :  { %s25_s22 = sshll.u32 %s3665_s21, 4  ;;  %p3594_p0 = scmp.ne.s32.totalorder %s4301_s0, %s3593_s25  ;;  %s26_s22 = int_to_ptr.vmem [resolvable:$true] %s25_s22 }
   0x4   :  { %p3597_p1 = scmp.lt.u32.totalorder %s3593_s25, %s4301_s0 }
   0x6   :  { %p3599_p2 = pnand %p3597_p1, %p3594_p0 }
   0x8   :  { %3602 = shalt.err (!%p3599_p2)
}
   0x9   :  { %s3603_s30 = scalar_lea.vmem %s26_s22, 256  ;;  %p3608_p4 = scmp.lt.s32.totalorder %s26_s22, %s26_s22 }
   0xa   :  { %p3604_p3 = scmp.ne.s32.totalorder %s26_s22, %s3603_s30  ;;  %p3609_p5 = scmp.lt.s32.totalorder %s3603_s30, %s3603_s30 }
   0xc   :  { %p3610_p6 = por %p3609_p5, %p3608_p4 }
   0xe   :  { %p3611_p7 = pnand %p3610_p6, %p3604_p3 }
  0x10   :  { %3614 = shalt.err (!%p3611_p7)
}
  0x11   :  { %s3666_s13 = smov 128   ;;  %s3667_s14 = smov 8  }
  0x12   :  { %31 = dma.hbm_to_vmem [thread:$0]  %s4301_s0, 256, %s26_s22, [#allocation3], %s3666_s13, %s3666_s13, %s3667_s14  }
  0x13   :  { %s3668_s17 = smov [#allocation5]   ;;  %s3615_s21 = scalar_lea.hbm %s4302_s1, 256 }
  0x14   :  { %s37_s18 = sshll.u32 %s3668_s17, 4  ;;  %p3616_p8 = scmp.ne.s32.totalorder %s4302_s1, %s3615_s21  ;;  %s38_s18 = int_to_ptr.vmem [resolvable:$true] %s37_s18 }
  0x15   :  { %p3619_p9 = scmp.lt.u32.totalorder %s3615_s21, %s4302_s1 }
  0x17   :  { %p3621_p10 = pnand %p3619_p9, %p3616_p8 }
  0x19   :  { %3624 = shalt.err (!%p3621_p10)
}
  0x1a   :  { %s3625_s27 = scalar_lea.vmem %s38_s18, 256  ;;  %p3630_p12 = scmp.lt.s32.totalorder %s38_s18, %s38_s18 }
  0x1b   :  { %p3626_p11 = scmp.ne.s32.totalorder %s38_s18, %s3625_s27  ;;  %p3631_p13 = scmp.lt.s32.totalorder %s3625_s27, %s3625_s27 }
  0x1d   :  { %p3632_p0 = por %p3631_p13, %p3630_p12 }
  0x1f   :  { %p3633_p1 = pnand %p3632_p0, %p3626_p11 }
  0x21   :  { %3636 = shalt.err (!%p3633_p1)
}
  0x22   :  { %43 = dma.hbm_to_vmem [thread:$0]  %s4302_s1, 256, %s38_s18, [#allocation6], %s3666_s13, %s3666_s13, %s3667_s14  }
  0x23   :  { %3659 = dma.done.wait [#allocation3], 256  }
  0x24   :  { %3660 = vsyncadd [#allocation3], 4294967040 }
  0x25   :  { %3661 = dma.done.wait [#allocation6], 256  }
  0x26   :  { %3662 = vsyncadd [#allocation6], 4294967040  ;;  %vm126_vm0 = vcmask 261120   ;;  %v70_v0 = vld [vmem:[#allocation2] sm:$0xff]  ;;  %v71_v1 = vld [vmem:[#allocation2 + $0x8] sm:$0xff]  ;;  %v154_v22 = vlaneseq  ;;  %vm271_vm1 = vcmask 64512  }
  0x27   :  { %v127_v2 = vsel %vm126_vm0, %v70_v0, 0.0  ;;  %v130_v3 = vsel %vm126_vm0, %v71_v1, 0.0  ;;  %v75_v14 = vld [vmem:[%s4304_s3] sm:$0xff]  ;;  %v76_v15 = vld [vmem:[%s4304_s3 + $0x8] sm:$0xff]  ;;  %v77_v16 = vld [vmem:[%s4304_s3 + $0x10] sm:$0xff]  ;;  %s3669_s23 = smov 120  }
  0x28   :  { %128 = vadd.xlane.f32.xlu0 %v127_v2  ;;  %v3241_v17 = vpack.c.bf16 %v76_v15, %v75_v14  ;;  %v78_v18 = vld [vmem:[%s4304_s3 + $0x18] sm:$0xff]  ;;  %v3788_v26 = vshrl.u32 %v154_v22, 7  ;;  %v74_v29 = vld [vmem:[%s4303_s2] sm:$0x3]  ;;  %s3670_s24 = smov 112   ;;  %s3671_s25 = smov 104   ;;  %vm3834_vm2 = vmpackc.low %vm271_vm1, %vm271_vm1 }
  0x29   :  { %v3245_v19 = vpack.c.bf16 %v78_v18, %v77_v16  ;;  %v2817_v41 = vld [vmem:[%s4305_s4] ss:$0 sm:$0xff]  ;;  %s3672_s26 = smov 96   ;;  %vm616_vm3 = vcmask 130048   ;;  %s3673_s27 = smov 64   ;;  %vm1081_vm4 = vcmask 195584  }
  0x2a   :  { %3242 = vmatprep.subr.bf16.mxu0 %v3241_v17  ;;  %v3791_v28 = vsub.s32 0, %v3788_v26  ;;  %v3797_v30 = vsub.s32 1, %v3788_v26  ;;  %s3674_s17 = smov 16   ;;  %s3675_s18 = smov 24   ;;  %vm1318_vm5 = vcmask 523264  }
  0x2b   :  { %3244 = vmatpush3.bf16.msra.mxu0 %v3241_v17  ;;  %s3676_s30 = smov [#allocation7]  }
  0x2c   :  { %131 = vadd.xlane.f32.xlu0 %v130_v3  ;;  %3246 = vmatprep.subr.bf16.mxu0 %v3245_v19  ;;  %v157_v31 = vrot.slane %v74_v29, %v3791_v28  ;;  %v163_v34 = vrot.slane %v74_v29, %v3797_v30  ;;  %s2804_s15 = sshll.u32 %s3676_s30, 4  ;;  %s2805_s15 = int_to_ptr.vmem [resolvable:$true] %s2804_s15 }
  0x2d   :  { %s3637_s16 = scalar_lea.vmem %s2805_s15, 256  ;;  %p3642_p3 = scmp.lt.s32.totalorder %s2805_s15, %s2805_s15 }
  0x2e   :  { %p3638_p2 = scmp.ne.s32.totalorder %s2805_s15, %s3637_s16  ;;  %p3643_p4 = scmp.lt.s32.totalorder %s3637_s16, %s3637_s16 }
  0x2f   :  { %3248 = vmatpush3.bf16.msra.mxu0 %v3245_v19 }
  0x30   :  { %p3644_p5 = por %p3643_p4, %p3642_p3 }
  0x32   :  { %p3645_p6 = pnand %p3644_p5, %p3638_p2 }
  0xb5   :  { %v129_v4 = vpop.xlane.xlu0 %128 }
  0xb6   :  { %v134_v5 = vmul.f32 0.03125, %v129_v4 }
  0xb8   :  { %v136_v6 = vsub.f32 %v70_v0, %v134_v5 }
  0xb9   :  { %v132_v7 = vpop.xlane.xlu0 %131 }
  0xba   :  { %v135_v8 = vmul.f32 0.03125, %v132_v7  ;;  %v138_v9 = vmul.f32 %v136_v6, %v136_v6 }
  0xbc   :  { %v137_v10 = vsub.f32 %v71_v1, %v135_v8  ;;  %v140_v11 = vsel %vm126_vm0, %v138_v9, 0.0  ;;  %v3864_v9 = vld [vmem:[#allocation5 + $0x8] sm:$0xff] }
  0xbd   :  { %141 = vadd.xlane.f32.xlu1 %v140_v11 }
  0xbe   :  { %v139_v12 = vmul.f32 %v137_v10, %v137_v10 }
  0xc0   :  { %v143_v13 = vsel %vm126_vm0, %v139_v12, 0.0 }
  0xc1   :  { %144 = vadd.xlane.f32.xlu1 %v143_v13 }
 0x14a   :  { %v142_v20 = vpop.xlane.xlu1 %141 }
 0x14b   :  { %v146_v21 = vmul.f32 0.03125, %v142_v20 }
 0x14d   :  { %v148_v23 = vadd.f32 1e-12, %v146_v21 }
 0x14e   :  { %v145_v24 = vpop.xlane.xlu1 %144 }
 0x14f   :  { %3501 = vrsqrt.f32 %v148_v23  ;;  %v147_v25 = vmul.f32 0.03125, %v145_v24 }
 0x151   :  { %v149_v27 = vadd.f32 1e-12, %v147_v25 }
 0x153   :  { %3503 = vrsqrt.f32 %v149_v27 }
 0x159   :  { %v3502_v32 = vpop.eup %3501 }
 0x15a   :  { %v152_v33 = vmul.f32 %v3502_v32, %v136_v6 }
 0x15c   :  { %v158_v35 = vmul.f32 %v157_v31, %v152_v33 }
 0x15d   :  { %v3504_v36 = vpop.eup %3503 }
 0x15e   :  { %v153_v37 = vmul.f32 %v3504_v36, %v137_v10  ;;  %v3801_v38 = vadd.f32 %v163_v34, %v158_v35  ;;  %v3866_v10 = vld [vmem:[#allocation5] sm:$0xff] }
 0x160   :  { %v159_v39 = vmul.f32 %v157_v31, %v153_v37  ;;  %3022 = vmatprep.mubr.msk.f32.mxu0 %vm126_vm0, %v3801_v38 }
 0x162   :  { %v3805_v40 = vadd.f32 %v163_v34, %v159_v39 }
 0x164   :  { %3023 = vmatmul.mubr.msk.f32.vlgmr.msra.gmra.mrb[0].mxu0 %vm126_vm0, %v3805_v40 }
 0x237   :  { %v3024_v42 = vpop.f32.mrb[0].mxu0 }
 0x238   :  { %v250_v43 = vadd.f32 %v3024_v42, %v2817_v41  ;;  %v244_v44 = vpop.f32.mrb[1].mxu0 }
 0x239   :  { %v245_v45 = vadd.f32 %v2817_v41, %v244_v44 }
 0x23a   :  { %257 = vrot.lane.b32.xlu1 %v250_v43, %s3669_s23 }
 0x23b   :  { %255 = vrot.lane.b32.xlu0 %v245_v45, %s3669_s23  ;;  %3029 = vmatprep.mubr.msk.f32.mxu1 %vm271_vm1, %v245_v45  ;;  %v3817_v46 = vpack.i.bf16 %v250_v43, %v245_v45 }
 0x23e   :  { %261 = vrot.lane.b32.xlu1 %v250_v43, %s3670_s24 }
 0x23f   :  { %263 = vrot.lane.b32.xlu0 %v245_v45, %s3671_s25 }
 0x242   :  { %259 = vrot.lane.b32.xlu1 %v245_v45, %s3670_s24 }
 0x243   :  { %3422 = vrot.lane.b32.xlu0 %v3817_v46, %s3672_s26 }
 0x246   :  { %265 = vrot.lane.b32.xlu1 %v250_v43, %s3671_s25 }
 0x2ac   :  { %v258_v47 = vpop.permute.xlu1 %257 }
 0x2ad   :  { %v256_v48 = vpop.permute.xlu0 %255 }
 0x2ae   :  { %v3823_v49 = vpack.i.bf16 %v258_v47, %v256_v48  ;;  %3036 = vmatprep.mubr.msk.f32.mxu0 %vm271_vm1, %v256_v48 }
 0x2b0   :  { %v262_v50 = vpop.permute.xlu1 %261  ;;  %3427 = vrot.lane.b32.xlu1 %v3823_v49, %s3672_s26 }
 0x2b1   :  { %v264_v51 = vpop.permute.xlu0 %263 }
 0x2b4   :  { %v260_v52 = vpop.permute.xlu1 %259 }
 0x2b5   :  { %v3828_v53 = vpack.i.bf16 %v262_v50, %v260_v52  ;;  %v3423_v54 = vpop.permute.xlu0 %3422 }
 0x2b6   :  { %v3425_v55 = vunpack.i.h.bf16 %v3423_v54  ;;  %v3424_v56 = vunpack.i.l.bf16 %v3423_v54 }
 0x2b7   :  { %3432 = vrot.lane.b32.xlu0 %v3828_v53, %s3672_s26 }
 0x2b8   :  { %v266_v58 = vpop.permute.xlu1 %265  ;;  %v3249_v59 = vpack.c.bf16 %v3425_v55, %v3424_v56 }
 0x2b9   :  { %v3838_v60 = vpack.i.bf16 %v266_v58, %v264_v51 }
 0x2ba   :  { %3251 = vmatprep.subr.msk.bf16.mxu1 %vm3834_vm2, %v3249_v59 }
 0x2bb   :  { %3437 = vrot.lane.b32.xlu1 %v3838_v60, %s3672_s26  ;;  %3254 = vmatpush3.bf16.xpose.msk.msra.mxu1 %vm3834_vm2, %v3249_v59 }
 0x2c2   :  { %3030 = vmatmul.mubr.msk.f32.vlgmr.msra.gmra.mrb[0].mxu1 %vm271_vm1, %v250_v43 }
 0x2c3   :  { %3043 = vmatprep.mubr.msk.f32.mxu1 %vm271_vm1, %v260_v52 }
 0x322   :  { %v3428_v61 = vpop.permute.xlu1 %3427 }
 0x323   :  { %v3430_v62 = vunpack.i.h.bf16 %v3428_v61  ;;  %v3429_v63 = vunpack.i.l.bf16 %v3428_v61 }
 0x325   :  { %v3255_v0 = vpack.c.bf16 %v3430_v62, %v3429_v63 }
 0x327   :  { %3257 = vmatprep.subr.msk.bf16.mxu0 %vm3834_vm2, %v3255_v0 }
 0x328   :  { %3260 = vmatpush3.bf16.xpose.msk.msra.mxu0 %vm3834_vm2, %v3255_v0 }
 0x329   :  { %v3433_v1 = vpop.permute.xlu0 %3432 }
 0x32a   :  { %v3435_v2 = vunpack.i.h.bf16 %v3433_v1  ;;  %v3434_v3 = vunpack.i.l.bf16 %v3433_v1 }
 0x32c   :  { %v3261_v4 = vpack.c.bf16 %v3435_v2, %v3434_v3 }
 0x32d   :  { %v3438_v5 = vpop.permute.xlu1 %3437 }
 0x32e   :  { %v3440_v6 = vunpack.i.h.bf16 %v3438_v5  ;;  %v3439_v7 = vunpack.i.l.bf16 %v3438_v5  ;;  %3263 = vmatprep.subr.msk.bf16.mxu1 %vm3834_vm2, %v3261_v4 }
 0x32f   :  { %3037 = vmatmul.mubr.msk.f32.vlgmr.msra.gmra.mrb[2].mxu0 %vm271_vm1, %v258_v47  ;;  %3266 = vmatpush3.bf16.xpose.msk.msra.mxu1 %vm3834_vm2, %v3261_v4 }
 0x330   :  { %v3267_v8 = vpack.c.bf16 %v3440_v6, %v3439_v7  ;;  %3050 = vmatprep.mubr.msk.f32.mxu0 %vm271_vm1, %v264_v51 }
 0x332   :  { %3269 = vmatprep.subr.msk.bf16.mxu0 %vm3834_vm2, %v3267_v8 }
 0x333   :  { %3272 = vmatpush3.bf16.xpose.msk.msra.mxu0 %vm3834_vm2, %v3267_v8 }
 0x336   :  { %3044 = vmatmul.mubr.msk.f32.vlgmr.msra.gmra.mrb[2].mxu1 %vm271_vm1, %v262_v50 }
 0x33a   :  { %3051 = vmatmul.mubr.msk.f32.vlgmr.msra.gmra.mrb[4].mxu0 %vm271_vm1, %v266_v58 }
 0x395   :  { %v3031_v11 = vpop.f32.mrb[0].mxu1 }
 0x396   :  { %v352_v12 = vadd.f32 %v3031_v11, %v3864_v9  ;;  %v346_v13 = vpop.f32.mrb[1].mxu1 }
 0x397   :  { %v347_v14 = vadd.f32 %v346_v13, %v3866_v10 }
 0x398   :  { %v620_v15 = vsel %vm616_vm3, %v352_v12, -inf }
 0x399   :  { %621 = vmax.xlane.f32.xlu1 %v620_v15  ;;  %v617_v16 = vsel %vm616_vm3, %v347_v14, -inf }
 0x39a   :  { %618 = vmax.xlane.f32.xlu0 %v617_v16 }
 0x402   :  { %v3038_v17 = vpop.f32.mrb[2].mxu0 }
 0x403   :  { %v439_v18 = vadd.f32 %v3038_v17, %v3864_v9  ;;  %v433_v19 = vpop.f32.mrb[3].mxu0 }
 0x404   :  { %v434_v20 = vadd.f32 %v433_v19, %v3866_v10 }
 0x405   :  { %v626_v21 = vsel %vm616_vm3, %v439_v18, -inf }
 0x406   :  { %627 = vmax.xlane.f32.xlu0 %v626_v21  ;;  %v623_v23 = vsel %vm616_vm3, %v434_v20, -inf }
 0x409   :  { %v3045_v22 = vpop.f32.mrb[2].mxu1 }
 0x40a   :  { %v526_v24 = vadd.f32 %v3045_v22, %v3864_v9  ;;  %v520_v25 = vpop.f32.mrb[3].mxu1  ;;  %624 = vmax.xlane.f32.xlu0 %v623_v23 }
 0x40b   :  { %v521_v27 = vadd.f32 %v520_v25, %v3866_v10 }
 0x40c   :  { %v632_v29 = vsel %vm616_vm3, %v526_v24, -inf }
 0x40d   :  { %v3052_v31 = vpop.f32.mrb[4].mxu0  ;;  %633 = vmax.xlane.f32.xlu1 %v632_v29  ;;  %v629_v32 = vsel %vm616_vm3, %v521_v27, -inf }
 0x40e   :  { %v613_v33 = vadd.f32 %v3052_v31, %v3864_v9  ;;  %v607_v34 = vpop.f32.mrb[5].mxu0  ;;  %630 = vmax.xlane.f32.xlu0 %v629_v32 }
 0x40f   :  { %v608_v35 = vadd.f32 %v607_v34, %v3866_v10 }
 0x410   :  { %v638_v36 = vsel %vm616_vm3, %v613_v33, -inf }
 0x411   :  { %639 = vmax.xlane.f32.xlu1 %v638_v36  ;;  %v635_v37 = vsel %vm616_vm3, %v608_v35, -inf }
 0x412   :  { %636 = vmax.xlane.f32.xlu0 %v635_v37 }
 0x426   :  { %v622_v39 = vpop.xlane.xlu1 %621 }
 0x427   :  { %v642_v41 = vsub.f32 %v352_v12, %v622_v39  ;;  %v619_v42 = vpop.xlane.xlu0 %618 }
 0x428   :  { %v641_v43 = vsub.f32 %v347_v14, %v619_v42 }
 0x429   :  { %v651_v44 = vmul.f32 1.442695, %v642_v41 }
 0x42a   :  { %v649_v45 = vmul.f32 1.442695, %v641_v43 }
 0x42b   :  { %3505 = vpow2.f32 %v651_v44 }
 0x42c   :  { %3507 = vpow2.f32 %v649_v45 }
 0x435   :  { %v3884_v47 = vpop.eup %3505 }
 0x436   :  { %v3508_v48 = vpop.eup %3507  ;;  %v668_v50 = vsel %vm616_vm3, %v3884_v47, 0.0 }
 0x437   :  { %669 = vadd.xlane.f32.xlu1 %v668_v50  ;;  %v665_v51 = vsel %vm616_vm3, %v3508_v48, 0.0 }
 0x438   :  { %666 = vadd.xlane.f32.xlu0 %v665_v51 }
 0x493   :  { %v628_v52 = vpop.xlane.xlu0 %627 }
 0x494   :  { %v644_v54 = vsub.f32 %v439_v18, %v628_v52 }
 0x496   :  { %v655_v55 = vmul.f32 1.442695, %v644_v54 }
 0x497   :  { %v625_v56 = vpop.xlane.xlu0 %624 }
 0x498   :  { %3509 = vpow2.f32 %v655_v55  ;;  %v643_v58 = vsub.f32 %v434_v20, %v625_v56 }
 0x49a   :  { %v653_v59 = vmul.f32 1.442695, %v643_v58  ;;  %v634_v61 = vpop.xlane.xlu1 %633 }
 0x49b   :  { %v646_v62 = vsub.f32 %v526_v24, %v634_v61  ;;  %v631_v63 = vpop.xlane.xlu0 %630 }
 0x49c   :  { %3511 = vpow2.f32 %v653_v59  ;;  %v645_v0 = vsub.f32 %v521_v27, %v631_v63 }
 0x49d   :  { %v659_v1 = vmul.f32 1.442695, %v646_v62 }
 0x49e   :  { %v657_v2 = vmul.f32 1.442695, %v645_v0  ;;  %v640_v3 = vpop.xlane.xlu1 %639 }
 0x49f   :  { %3513 = vpow2.f32 %v659_v1  ;;  %v648_v4 = vsub.f32 %v613_v33, %v640_v3  ;;  %v637_v5 = vpop.xlane.xlu0 %636 }
 0x4a0   :  { %3515 = vpow2.f32 %v657_v2  ;;  %v647_v6 = vsub.f32 %v608_v35, %v637_v5  ;;  %v85_v5 = vld [vmem:[%s4306_s5] sm:$0xff] }
 0x4a1   :  { %v663_v7 = vmul.f32 1.442695, %v648_v4 }
 0x4a2   :  { %v3889_v8 = vpop.eup %3509  ;;  %v661_v11 = vmul.f32 1.442695, %v647_v6  ;;  %v86_v6 = vld [vmem:[%s4306_s5 + $0x8] sm:$0xff] }
 0x4a3   :  { %3517 = vpow2.f32 %v663_v7  ;;  %v674_v12 = vsel %vm616_vm3, %v3889_v8, 0.0  ;;  %v3289_v7 = vpack.c.bf16 %v86_v6, %v85_v5  ;;  %v1205_v5 = vsub.s32 2, %v3788_v26 }
 0x4a4   :  { %3519 = vpow2.f32 %v661_v11  ;;  %675 = vadd.xlane.f32.xlu1 %v674_v12  ;;  %v88_v11 = vld [vmem:[%s4306_s5 + $0x18] sm:$0xff] }
 0x4a5   :  { %3290 = vmatprep.subr.bf16.mxu0 %v3289_v7 }
 0x4a6   :  { %v3512_v13 = vpop.eup %3511  ;;  %3292 = vmatpush3.bf16.msra.mxu0 %v3289_v7 }
 0x4a7   :  { %v671_v14 = vsel %vm616_vm3, %v3512_v13, 0.0 }
 0x4a8   :  { %672 = vadd.xlane.f32.xlu0 %v671_v14 }
 0x4a9   :  { %v3894_v15 = vpop.eup %3513 }
 0x4aa   :  { %v3896_v16 = vpop.eup %3515  ;;  %v680_v17 = vsel %vm616_vm3, %v3894_v15, 0.0 }
 0x4ab   :  { %681 = vadd.xlane.f32.xlu1 %v680_v17  ;;  %v677_v18 = vsel %vm616_vm3, %v3896_v16, 0.0 }
 0x4ac   :  { %678 = vadd.xlane.f32.xlu0 %v677_v18 }
 0x4ad   :  { %v3902_v19 = vpop.eup %3517 }
 0x4ae   :  { %v3904_v20 = vpop.eup %3519  ;;  %v686_v21 = vsel %vm616_vm3, %v3902_v19, 0.0 }
 0x4af   :  { %687 = vadd.xlane.f32.xlu1 %v686_v21  ;;  %v683_v22 = vsel %vm616_vm3, %v3904_v20, 0.0 }
 0x4b0   :  { %684 = vadd.xlane.f32.xlu0 %v683_v22 }
 0x4c0   :  { %3447 = vrot.lane.b32.xlu1 %v3823_v49, %s3673_s27 }
 0x4c4   :  { %3452 = vrot.lane.b32.xlu1 %v3828_v53, %s3673_s27  ;;  %v670_v27 = vpop.xlane.xlu1 %669 }
 0x4c5   :  { %v667_v23 = vpop.xlane.xlu0 %666 }
 0x4c6   :  { %3521 = vrcp.f32 %v667_v23  ;;  %3442 = vrot.lane.b32.xlu0 %v3817_v46, %s3673_s27 }
 0x4c7   :  { %3523 = vrcp.f32 %v670_v27 }
 0x4c8   :  { %3457 = vrot.lane.b32.xlu1 %v3838_v60, %s3673_s27 }
 0x4d0   :  { %v3522_v24 = vpop.eup %3521 }
 0x4d1   :  { %v690_v25 = vmul.f32 %v3522_v24, %v3508_v48  ;;  %v3524_v42 = vpop.eup %3523 }
 0x4d2   :  { %v692_v50 = vmul.f32 %v3524_v42, %v3884_v47 }
 0x4d3   :  { %3057 = vmatprep.mubr.msk.f32.mxu1 %vm616_vm3, %v690_v25 }
 0x531   :  { %v676_v29 = vpop.xlane.xlu1 %675 }
 0x535   :  { %v673_v31 = vpop.xlane.xlu0 %672 }
 0x536   :  { %3525 = vrcp.f32 %v673_v31 }
 0x537   :  { %3527 = vrcp.f32 %v676_v29 }
 0x538   :  { %v682_v32 = vpop.xlane.xlu1 %681 }
 0x539   :  { %v679_v49 = vpop.xlane.xlu0 %678 }
 0x53a   :  { %3529 = vrcp.f32 %v679_v49 }
 0x53b   :  { %3531 = vrcp.f32 %v682_v32 }
 0x53c   :  { %v688_v53 = vpop.xlane.xlu1 %687 }
 0x53d   :  { %v685_v33 = vpop.xlane.xlu0 %684 }
 0x53e   :  { %3533 = vrcp.f32 %v685_v33 }
 0x53f   :  { %3535 = vrcp.f32 %v688_v53 }
 0x540   :  { %v3448_v34 = vpop.permute.xlu1 %3447  ;;  %v3526_v43 = vpop.eup %3525 }
 0x541   :  { %v3443_v46 = vpop.permute.xlu0 %3442  ;;  %v3450_v35 = vunpack.i.h.bf16 %v3448_v34  ;;  %v3449_v36 = vunpack.i.l.bf16 %v3448_v34  ;;  %v3528_v52 = vpop.eup %3527  ;;  %v694_v54 = vmul.f32 %v3526_v43, %v3512_v13  ;;  %v3961_v34 = vld [vmem:[%s4310_s9] sm:$0x3f] }
 0x542   :  { %v3445_v60 = vunpack.i.h.bf16 %v3443_v46  ;;  %v3444_v37 = vunpack.i.l.bf16 %v3443_v46  ;;  %v696_v61 = vmul.f32 %v3528_v52, %v3889_v8  ;;  %v87_v8 = vld [vmem:[%s4306_s5 + $0x10] sm:$0xff]  ;;  %v1087_v46 = vrot.slane %v3961_v34, %v3791_v28 }
 0x543   :  { %v3277_v44 = vpack.c.bf16 %v3450_v35, %v3449_v36  ;;  %v3293_v12 = vpack.c.bf16 %v88_v11, %v87_v8  ;;  %v1200_v6 = vrot.slane %v3961_v34, %v3797_v30  ;;  %v1206_v11 = vrot.slane %v3961_v34, %v1205_v5 }
 0x544   :  { %v3273_v39 = vpack.c.bf16 %v3445_v60, %v3444_v37  ;;  %v3453_v41 = vpop.permute.xlu1 %3452  ;;  %v3530_v55 = vpop.eup %3529 }
 0x545   :  { %v3455_v45 = vunpack.i.h.bf16 %v3453_v41  ;;  %v3454_v48 = vunpack.i.l.bf16 %v3453_v41  ;;  %v3532_v62 = vpop.eup %3531  ;;  %v698_v63 = vmul.f32 %v3530_v55, %v3896_v16  ;;  %3294 = vmatprep.subr.bf16.mxu0 %v3293_v12 }
 0x546   :  { %3274 = vmatprep.subr.bf16.mxu1 %v3273_v39  ;;  %v700_v1 = vmul.f32 %v3532_v62, %v3894_v15  ;;  %3296 = vmatpush3.bf16.msra.mxu0 %v3293_v12  ;;  %v96_v62 = vld [vmem:[%s4307_s6 + $0x18] sm:$0xff] }
 0x547   :  { %3276 = vmatpush3.bf16.msra.mxu1 %v3273_v39  ;;  %v3281_v56 = vpack.c.bf16 %v3455_v45, %v3454_v48 }
 0x548   :  { %v3458_v51 = vpop.permute.xlu1 %3457  ;;  %3278 = vmatprep.subr.bf16.mxu1 %v3277_v44  ;;  %v3534_v47 = vpop.eup %3533 }
 0x549   :  { %v3460_v58 = vunpack.i.h.bf16 %v3458_v51  ;;  %v3459_v59 = vunpack.i.l.bf16 %v3458_v51  ;;  %v3536_v2 = vpop.eup %3535  ;;  %v702_v3 = vmul.f32 %v3534_v47, %v3904_v20 }
 0x54a   :  { %3058 = vmatmul.mubr.msk.f32.vlgmr.msra.gmra.mrb[4].mxu1 %vm616_vm3, %v692_v50  ;;  %v704_v4 = vmul.f32 %v3536_v2, %v3902_v19 }
 0x54b   :  { %3280 = vmatpush3.bf16.msra.mxu1 %v3277_v44  ;;  %3064 = vmatprep.mubr.msk.f32.mxu1 %vm616_vm3, %v694_v54  ;;  %v3285_v0 = vpack.c.bf16 %v3460_v58, %v3459_v59  ;;  %v94_v58 = vld [vmem:[%s4307_s6 + $0x8] sm:$0xff] }
 0x54c   :  { %3282 = vmatprep.subr.bf16.mxu1 %v3281_v56 }
 0x54e   :  { %3065 = vmatmul.mubr.msk.f32.vlgmr.msra.gmra.mrb[6].mxu1 %vm616_vm3, %v696_v61  ;;  %v95_v61 = vld [vmem:[%s4307_s6 + $0x10] sm:$0xff] }
 0x54f   :  { %3284 = vmatpush3.bf16.msra.mxu1 %v3281_v56  ;;  %3071 = vmatprep.mubr.msk.f32.mxu1 %vm616_vm3, %v698_v63  ;;  %v3301_v63 = vpack.c.bf16 %v96_v62, %v95_v61 }
 0x550   :  { %3286 = vmatprep.subr.bf16.mxu1 %v3285_v0 }
 0x552   :  { %3072 = vmatmul.mubr.msk.f32.vlgmr.msra.gmra.mrb[8].mxu1 %vm616_vm3, %v700_v1 }
 0x553   :  { %3288 = vmatpush3.bf16.msra.mxu1 %v3285_v0  ;;  %3078 = vmatprep.mubr.msk.f32.mxu1 %vm616_vm3, %v702_v3 }
 0x556   :  { %3079 = vmatmul.mubr.msk.f32.vlgmr.msra.gmra.mrb[10].mxu1 %vm616_vm3, %v704_v4 }
 0x61d   :  { %v3059_v13 = vpop.f32.mrb[4].mxu1 }
 0x61e   :  { %v783_v14 = vpop.f32.mrb[5].mxu1 }
 0x621   :  { %v3066_v15 = vpop.f32.mrb[6].mxu1 }
 0x622   :  { %1057 = vrot.lane.b32.xlu1 %v3066_v15, %s3667_s14  ;;  %v870_v16 = vpop.f32.mrb[7].mxu1 }
 0x623   :  { %1055 = vrot.lane.b32.xlu0 %v870_v16, %s3667_s14 }
 0x625   :  { %v3073_v17 = vpop.f32.mrb[8].mxu1 }
 0x626   :  { %1065 = vrot.lane.b32.xlu1 %v3073_v17, %s3674_s17  ;;  %v957_v18 = vpop.f32.mrb[9].mxu1 }
 0x627   :  { %1063 = vrot.lane.b32.xlu0 %v957_v18, %s3674_s17  ;;  %v103_v18 = vld [vmem:[%s4309_s8] sm:$0xff] }
 0x629   :  { %v3080_v19 = vpop.f32.mrb[10].mxu1 }
 0x62a   :  { %1073 = vrot.lane.b32.xlu1 %v3080_v19, %s3675_s18  ;;  %v1044_v20 = vpop.f32.mrb[11].mxu1  ;;  %v104_v19 = vld [vmem:[%s4309_s8 + $0x8] sm:$0xff] }
 0x62b   :  { %1071 = vrot.lane.b32.xlu0 %v1044_v20, %s3675_s18  ;;  %v3305_v20 = vpack.c.bf16 %v104_v19, %v103_v18  ;;  %v80_v18 = vld [vmem:[%s4304_s3 + $0x28] sm:$0xff] }
 0x62d   :  { %3306 = vmatprep.subr.bf16.mxu0 %v3305_v20 }
 0x694   :  { %v1058_v21 = vpop.permute.xlu1 %1057 }
 0x695   :  { %v1056_v22 = vpop.permute.xlu0 %1055  ;;  %v1078_v29 = vsel %vm271_vm1, %v3059_v13, %v1058_v21  ;;  %v105_v21 = vld [vmem:[%s4309_s8 + $0x10] sm:$0xff] }
 0x696   :  { %v1077_v25 = vsel %vm271_vm1, %v783_v14, %v1056_v22  ;;  %v106_v22 = vld [vmem:[%s4309_s8 + $0x18] sm:$0xff] }
 0x698   :  { %v1066_v23 = vpop.permute.xlu1 %1065 }
 0x699   :  { %v1064_v24 = vpop.permute.xlu0 %1063  ;;  %v1080_v49 = vsel %vm616_vm3, %v1078_v29, %v1066_v23  ;;  %v3309_v23 = vpack.c.bf16 %v106_v22, %v105_v21  ;;  %v109_v29 = vld [vmem:[%s4309_s8 + $0x30] sm:$0xff]  ;;  %v82_v21 = vld [vmem:[%s4304_s3 + $0x38] sm:$0xff] }
 0x69a   :  { %v1079_v31 = vsel %vm616_vm3, %v1077_v25, %v1064_v24  ;;  %v107_v24 = vld [vmem:[%s4309_s8 + $0x20] sm:$0xff]  ;;  %v108_v25 = vld [vmem:[%s4309_s8 + $0x28] sm:$0xff] }
 0x69c   :  { %v1074_v27 = vpop.permute.xlu1 %1073 }
 0x69d   :  { %v1072_v32 = vpop.permute.xlu0 %1071  ;;  %v1083_v33 = vsel %vm1081_vm4, %v1080_v49, %v1074_v27  ;;  %v3313_v27 = vpack.c.bf16 %v108_v25, %v107_v24  ;;  %v2846_v49 = vld [vmem:[%s4308_s7] ss:$0 sm:$0xff] }
 0x69e   :  { %v1082_v53 = vsel %vm1081_vm4, %v1079_v31, %v1072_v32  ;;  %v110_v31 = vld [vmem:[%s4309_s8 + $0x38] sm:$0xff] }
 0x69f   :  { %3089 = vmatprep.mubr.msk.f32.mxu0 %vm126_vm0, %v1082_v53  ;;  %v3317_v32 = vpack.c.bf16 %v110_v31, %v109_v29 }
 0x6a0   :  { %3090 = vmatmul.mubr.msk.f32.vlgmr.msra.gmra.mrb[6].mxu0 %vm126_vm0, %v1083_v33 }
 0x6a1   :  { %3308 = vmatpush3.bf16.msra.mxu0 %v3305_v20  ;;  %v81_v20 = vld [vmem:[%s4304_s3 + $0x30] sm:$0xff] }
 0x6a2   :  { %3310 = vmatprep.subr.bf16.mxu0 %v3309_v23  ;;  %v3325_v22 = vpack.c.bf16 %v82_v21, %v81_v20 }
 0x6a5   :  { %3312 = vmatpush3.bf16.msra.mxu0 %v3309_v23 }
 0x6a6   :  { %3314 = vmatprep.subr.bf16.mxu0 %v3313_v27 }
 0x6a9   :  { %3316 = vmatpush3.bf16.msra.mxu0 %v3313_v27 }
 0x6aa   :  { %3318 = vmatprep.subr.bf16.mxu0 %v3317_v32 }
 0x6ad   :  { %3320 = vmatpush3.bf16.msra.mxu0 %v3317_v32  ;;  %v1430_v32 = vsub.s32 4, %v3788_v26 }
 0x773   :  { %v3091_v35 = vpop.f32.mrb[6].mxu0 }
 0x774   :  { %v1166_v36 = vadd.f32 %v3091_v35, %v1087_v46  ;;  %v1160_v60 = vpop.f32.mrb[7].mxu0 }
 0x775   :  { %v1161_v37 = vadd.f32 %v1160_v60, %v1087_v46 }
 0x776   :  { %v1170_v39 = vadd.f32 %v1166_v36, %v3805_v40 }
 0x777   :  { %v1169_v41 = vadd.f32 %v1161_v37, %v3801_v38  ;;  %v93_v38 = vld [vmem:[%s4307_s6] sm:$0xff] }
 0x778   :  { %v1174_v42 = vsel %vm126_vm0, %v1170_v39, 0.0  ;;  %v3297_v59 = vpack.c.bf16 %v94_v58, %v93_v38  ;;  %v1316_v58 = vsub.s32 3, %v3788_v26 }
 0x779   :  { %1175 = vadd.xlane.f32.xlu1 %v1174_v42  ;;  %v1171_v43 = vsel %vm126_vm0, %v1169_v41, 0.0 }
 0x77a   :  { %1172 = vadd.xlane.f32.xlu0 %v1171_v43  ;;  %3298 = vmatprep.subr.bf16.mxu1 %v3297_v59 }
 0x77b   :  { %3300 = vmatpush3.bf16.msra.mxu1 %v3297_v59  ;;  %v1317_v59 = vrot.slane %v3961_v34, %v1316_v58 }
 0x77c   :  { %3302 = vmatprep.subr.bf16.mxu1 %v3301_v63 }
 0x77f   :  { %3304 = vmatpush3.bf16.msra.mxu1 %v3301_v63 }
 0x806   :  { %v1176_v44 = vpop.xlane.xlu1 %1175 }
 0x807   :  { %v1178_v45 = vmul.f32 0.03125, %v1176_v44  ;;  %v1173_v48 = vpop.xlane.xlu0 %1172 }
 0x808   :  { %v1177_v50 = vmul.f32 0.03125, %v1173_v48 }
 0x809   :  { %v1180_v51 = vsub.f32 %v1170_v39, %v1178_v45 }
 0x80a   :  { %v1179_v52 = vsub.f32 %v1169_v41, %v1177_v50 }
 0x80b   :  { %v1182_v56 = vmul.f32 %v1180_v51, %v1180_v51 }
 0x80c   :  { %v1181_v54 = vmul.f32 %v1179_v52, %v1179_v52 }
 0x80d   :  { %v1186_v40 = vsel %vm126_vm0, %v1182_v56, 0.0 }
 0x80e   :  { %v1183_v55 = vsel %vm126_vm0, %v1181_v54, 0.0 }
 0x80f   :  { %1184 = vadd.xlane.f32.xlu0 %v1183_v55 }
 0x813   :  { %1187 = vadd.xlane.f32.xlu0 %v1186_v40 }
 0x89c   :  { %v1185_v47 = vpop.xlane.xlu0 %1184 }
 0x89d   :  { %v1189_v0 = vmul.f32 0.03125, %v1185_v47 }
 0x89f   :  { %v1191_v1 = vadd.f32 1e-12, %v1189_v0 }
 0x8a0   :  { %v1188_v2 = vpop.xlane.xlu0 %1187 }
 0x8a1   :  { %3537 = vrsqrt.f32 %v1191_v1  ;;  %v1190_v3 = vmul.f32 0.03125, %v1188_v2 }
 0x8a3   :  { %v1192_v4 = vadd.f32 1e-12, %v1190_v3 }
 0x8a5   :  { %3539 = vrsqrt.f32 %v1192_v4 }
 0x8ab   :  { %v3538_v7 = vpop.eup %3537 }
 0x8ac   :  { %v1195_v8 = vmul.f32 %v3538_v7, %v1179_v52 }
 0x8ae   :  { %v1201_v12 = vmul.f32 %v1200_v6, %v1195_v8 }
 0x8af   :  { %v3540_v13 = vpop.eup %3539 }
 0x8b0   :  { %v1196_v14 = vmul.f32 %v3540_v13, %v1180_v51  ;;  %v1207_v15 = vadd.f32 %v1206_v11, %v1201_v12 }
 0x8b2   :  { %v1202_v16 = vmul.f32 %v1200_v6, %v1196_v14  ;;  %3100 = vmatprep.mubr.msk.f32.mxu1 %vm126_vm0, %v1207_v15 }
 0x8b4   :  { %v1208_v17 = vadd.f32 %v1206_v11, %v1202_v16 }
 0x8b6   :  { %3101 = vmatmul.mubr.msk.f32.vlgmr.msra.gmra.mrb[12].mxu1 %vm126_vm0, %v1208_v17 }
 0x989   :  { %v3102_v53 = vpop.f32.mrb[12].mxu1 }
 0x98a   :  { %v1293_v33 = vadd.f32 %v3102_v53, %v2846_v49  ;;  %v1287_v46 = vpop.f32.mrb[13].mxu1  ;;  %v1431_v53 = vrot.slane %v3961_v34, %v1430_v32 }
 0x98b   :  { %v1288_v35 = vadd.f32 %v2846_v49, %v1287_v46  ;;  %v1436_v49 = vsub.s32 5, %v3788_v26 }
 0x98c   :  { %v1297_v36 = vmul.f32 %v1293_v33, %v1293_v33 }
 0x98d   :  { %v1296_v60 = vmul.f32 %v1288_v35, %v1288_v35 }
 0x98e   :  { %v1299_v37 = vmul.f32 %v1297_v36, %v1293_v33 }
 0x98f   :  { %v1298_v39 = vmul.f32 %v1296_v60, %v1288_v35  ;;  %v1437_v60 = vrot.slane %v3961_v34, %v1436_v49 }
 0x990   :  { %v1301_v41 = vmul.f32 0.044715, %v1299_v37 }
 0x991   :  { %v1300_v42 = vmul.f32 0.044715, %v1298_v39 }
 0x992   :  { %v1303_v43 = vadd.f32 %v1301_v41, %v1293_v33 }
 0x993   :  { %v1302_v44 = vadd.f32 %v1300_v42, %v1288_v35 }
 0x994   :  { %v1305_v45 = vmul.f32 0.7978846, %v1303_v43  ;;  %v2851_v43 = vld [vmem:[%s4305_s4 + $0x1] ss:$0 sm:$0xff] }
 0x995   :  { %v1304_v48 = vmul.f32 0.7978846, %v1302_v44 }
 0x996   :  { %3541 = vtanh.f32 %v1305_v45 }
 0x997   :  { %3543 = vtanh.f32 %v1304_v48 }
 0x9a0   :  { %v3542_v50 = vpop.eup %3541 }
 0x9a1   :  { %v3544_v51 = vpop.eup %3543  ;;  %v1309_v52 = vadd.f32 1.0, %v3542_v50 }
 0x9a2   :  { %v1308_v54 = vadd.f32 1.0, %v3544_v51 }
 0x9a3   :  { %v1311_v55 = vmul.f32 0.5, %v1309_v52 }
 0x9a4   :  { %v1310_v56 = vmul.f32 0.5, %v1308_v54 }
 0x9a5   :  { %v1313_v38 = vmul.f32 %v1311_v55, %v1293_v33 }
 0x9a6   :  { %v1312_v40 = vmul.f32 %v1310_v56, %v1288_v35 }
 0x9a8   :  { %3119 = vmatprep.mubr.msk.f32.mxu0 %vm1318_vm5, %v1312_v40 }
 0x9a9   :  { %3120 = vmatmul.mubr.msk.f32.vlgmr.msra.gmra.mrb[8].mxu0 %vm1318_vm5, %v1313_v38 }
 0xa7c   :  { %v3121_v61 = vpop.f32.mrb[8].mxu0 }
 0xa7d   :  { %v1397_v62 = vadd.f32 %v3121_v61, %v1317_v59  ;;  %v1391_v63 = vpop.f32.mrb[9].mxu0 }
 0xa7e   :  { %v1392_v47 = vadd.f32 %v1391_v63, %v1317_v59 }
 0xa7f   :  { %v1401_v0 = vadd.f32 %v1397_v62, %v1208_v17 }
 0xa80   :  { %v1400_v1 = vadd.f32 %v1392_v47, %v1207_v15  ;;  %v79_v15 = vld [vmem:[%s4304_s3 + $0x20] sm:$0xff] }
 0xa81   :  { %v1405_v2 = vsel %vm126_vm0, %v1401_v0, 0.0  ;;  %v3321_v19 = vpack.c.bf16 %v80_v18, %v79_v15 }
 0xa82   :  { %1406 = vadd.xlane.f32.xlu1 %v1405_v2  ;;  %v1402_v3 = vsel %vm126_vm0, %v1400_v1, 0.0 }
 0xa83   :  { %1403 = vadd.xlane.f32.xlu0 %v1402_v3  ;;  %3322 = vmatprep.subr.bf16.mxu1 %v3321_v19 }
 0xa84   :  { %3324 = vmatpush3.bf16.msra.mxu1 %v3321_v19 }
 0xa85   :  { %3326 = vmatprep.subr.bf16.mxu1 %v3325_v22 }
 0xa88   :  { %3328 = vmatpush3.bf16.msra.mxu1 %v3325_v22 }
 0xb0f   :  { %v1407_v4 = vpop.xlane.xlu1 %1406 }
 0xb10   :  { %v1409_v6 = vmul.f32 0.03125, %v1407_v4  ;;  %v1404_v7 = vpop.xlane.xlu0 %1403 }
 0xb11   :  { %v1408_v8 = vmul.f32 0.03125, %v1404_v7 }
 0xb12   :  { %v1411_v11 = vsub.f32 %v1401_v0, %v1409_v6 }
 0xb13   :  { %v1410_v12 = vsub.f32 %v1400_v1, %v1408_v8 }
 0xb14   :  { %v1413_v13 = vmul.f32 %v1411_v11, %v1411_v11 }
 0xb15   :  { %v1412_v14 = vmul.f32 %v1410_v12, %v1410_v12 }
 0xb16   :  { %v1417_v16 = vsel %vm126_vm0, %v1413_v13, 0.0 }
 0xb17   :  { %1418 = vadd.xlane.f32.xlu1 %v1417_v16  ;;  %v1414_v17 = vsel %vm126_vm0, %v1412_v14, 0.0 }
 0xb18   :  { %1415 = vadd.xlane.f32.xlu0 %v1414_v17 }
 0xba4   :  { %v1419_v23 = vpop.xlane.xlu1 %1418 }
 0xba5   :  { %v1421_v24 = vmul.f32 0.03125, %v1419_v23  ;;  %v1416_v25 = vpop.xlane.xlu0 %1415 }
 0xba6   :  { %v1420_v27 = vmul.f32 0.03125, %v1416_v25 }
 0xba7   :  { %v1423_v29 = vadd.f32 1e-12, %v1421_v24 }
 0xba8   :  { %v1422_v31 = vadd.f32 1e-12, %v1420_v27 }
 0xba9   :  { %3545 = vrsqrt.f32 %v1423_v29 }
 0xbaa   :  { %3547 = vrsqrt.f32 %v1422_v31 }
 0xbb3   :  { %v3546_v33 = vpop.eup %3545 }
 0xbb4   :  { %v3548_v46 = vpop.eup %3547  ;;  %v1427_v35 = vmul.f32 %v3546_v33, %v1411_v11 }
 0xbb5   :  { %v1426_v36 = vmul.f32 %v3548_v46, %v1410_v12 }
 0xbb6   :  { %v1433_v37 = vmul.f32 %v1431_v53, %v1427_v35 }
 0xbb7   :  { %v1432_v39 = vmul.f32 %v1431_v53, %v1426_v36 }
 0xbb8   :  { %v4050_v42 = vadd.f32 %v1437_v60, %v1433_v37 }
 0xbb9   :  { %v4048_v41 = vadd.f32 %v1437_v60, %v1432_v39 }
 0xbbb   :  { %3130 = vmatprep.mubr.msk.f32.mxu1 %vm126_vm0, %v4048_v41 }
 0xbbc   :  { %3131 = vmatmul.mubr.msk.f32.vlgmr.msra.gmra.mrb[14].mxu1 %vm126_vm0, %v4050_v42 }
 0xc8f   :  { %v3132_v44 = vpop.f32.mrb[14].mxu1 }
 0xc90   :  { %v1524_v45 = vadd.f32 %v3132_v44, %v2851_v43  ;;  %v1518_v48 = vpop.f32.mrb[15].mxu1 }
 0xc91   :  { %v1519_v34 = vadd.f32 %v2851_v43, %v1518_v48 }
 0xc92   :  { %1531 = vrot.lane.b32.xlu1 %v1524_v45, %s3669_s23 }
 0xc93   :  { %1529 = vrot.lane.b32.xlu0 %v1519_v34, %s3669_s23  ;;  %3137 = vmatprep.mubr.msk.f32.mxu1 %vm271_vm1, %v1519_v34  ;;  %v4064_v50 = vpack.i.bf16 %v1524_v45, %v1519_v34 }
 0xc96   :  { %1535 = vrot.lane.b32.xlu1 %v1524_v45, %s3670_s24 }
 0xc97   :  { %1537 = vrot.lane.b32.xlu0 %v1519_v34, %s3671_s25 }
 0xc9a   :  { %1533 = vrot.lane.b32.xlu1 %v1519_v34, %s3670_s24 }
 0xc9b   :  { %3462 = vrot.lane.b32.xlu0 %v4064_v50, %s3672_s26 }
 0xc9e   :  { %1539 = vrot.lane.b32.xlu1 %v1524_v45, %s3671_s25 }
 0xd04   :  { %v1532_v51 = vpop.permute.xlu1 %1531 }
 0xd05   :  { %v1530_v52 = vpop.permute.xlu0 %1529 }
 0xd06   :  { %v4070_v54 = vpack.i.bf16 %v1532_v51, %v1530_v52  ;;  %3144 = vmatprep.mubr.msk.f32.mxu0 %vm271_vm1, %v1530_v52 }
 0xd08   :  { %v1536_v55 = vpop.permute.xlu1 %1535  ;;  %3467 = vrot.lane.b32.xlu1 %v4070_v54, %s3672_s26 }
 0xd09   :  { %v1538_v56 = vpop.permute.xlu0 %1537 }
 0xd0c   :  { %v1534_v40 = vpop.permute.xlu1 %1533 }
 0xd0d   :  { %v4075_v38 = vpack.i.bf16 %v1536_v55, %v1534_v40  ;;  %v3463_v59 = vpop.permute.xlu0 %3462 }
 0xd0e   :  { %v3465_v61 = vunpack.i.h.bf16 %v3463_v59  ;;  %v3464_v62 = vunpack.i.l.bf16 %v3463_v59 }
 0xd0f   :  { %3472 = vrot.lane.b32.xlu0 %v4075_v38, %s3672_s26 }
 0xd10   :  { %v3329_v63 = vpack.c.bf16 %v3465_v61, %v3464_v62  ;;  %v1540_v47 = vpop.permute.xlu1 %1539 }
 0xd11   :  { %v4079_v0 = vpack.i.bf16 %v1540_v47, %v1538_v56 }
 0xd12   :  { %3331 = vmatprep.subr.msk.bf16.mxu1 %vm3834_vm2, %v3329_v63 }
 0xd13   :  { %3477 = vrot.lane.b32.xlu1 %v4079_v0, %s3672_s26  ;;  %3334 = vmatpush3.bf16.xpose.msk.msra.mxu1 %vm3834_vm2, %v3329_v63 }
 0xd1a   :  { %3138 = vmatmul.mubr.msk.f32.vlgmr.msra.gmra.mrb[16].mxu1 %vm271_vm1, %v1524_v45 }
 0xd1b   :  { %3151 = vmatprep.mubr.msk.f32.mxu1 %vm271_vm1, %v1534_v40 }
 0xd7a   :  { %v3468_v1 = vpop.permute.xlu1 %3467 }
 0xd7b   :  { %v3470_v2 = vunpack.i.h.bf16 %v3468_v1  ;;  %v3469_v3 = vunpack.i.l.bf16 %v3468_v1 }
 0xd7d   :  { %v3335_v4 = vpack.c.bf16 %v3470_v2, %v3469_v3 }
 0xd7f   :  { %3337 = vmatprep.subr.msk.bf16.mxu0 %vm3834_vm2, %v3335_v4 }
 0xd80   :  { %3340 = vmatpush3.bf16.xpose.msk.msra.mxu0 %vm3834_vm2, %v3335_v4 }
 0xd81   :  { %v3473_v6 = vpop.permute.xlu0 %3472 }
 0xd82   :  { %v3475_v7 = vunpack.i.h.bf16 %v3473_v6  ;;  %v3474_v8 = vunpack.i.l.bf16 %v3473_v6 }
 0xd84   :  { %v3341_v11 = vpack.c.bf16 %v3475_v7, %v3474_v8 }
 0xd85   :  { %v3478_v12 = vpop.permute.xlu1 %3477 }
 0xd86   :  { %v3480_v13 = vunpack.i.h.bf16 %v3478_v12  ;;  %v3479_v14 = vunpack.i.l.bf16 %v3478_v12  ;;  %3343 = vmatprep.subr.msk.bf16.mxu1 %vm3834_vm2, %v3341_v11 }
 0xd87   :  { %3145 = vmatmul.mubr.msk.f32.vlgmr.msra.gmra.mrb[10].mxu0 %vm271_vm1, %v1532_v51  ;;  %3346 = vmatpush3.bf16.xpose.msk.msra.mxu1 %vm3834_vm2, %v3341_v11 }
 0xd88   :  { %v3347_v16 = vpack.c.bf16 %v3480_v13, %v3479_v14  ;;  %3158 = vmatprep.mubr.msk.f32.mxu0 %vm271_vm1, %v1538_v56 }
 0xd8a   :  { %3349 = vmatprep.subr.msk.bf16.mxu0 %vm3834_vm2, %v3347_v16 }
 0xd8b   :  { %3352 = vmatpush3.bf16.xpose.msk.msra.mxu0 %vm3834_vm2, %v3347_v16 }
 0xd8e   :  { %3152 = vmatmul.mubr.msk.f32.vlgmr.msra.gmra.mrb[18].mxu1 %vm271_vm1, %v1536_v55 }
 0xd92   :  { %3159 = vmatmul.mubr.msk.f32.vlgmr.msra.gmra.mrb[12].mxu0 %vm271_vm1, %v1540_v47 }
 0xded   :  { %v3139_v17 = vpop.f32.mrb[16].mxu1 }
 0xdee   :  { %v1625_v15 = vadd.f32 %v3139_v17, %v3864_v9  ;;  %v1619_v18 = vpop.f32.mrb[17].mxu1 }
 0xdef   :  { %v1620_v19 = vadd.f32 %v1619_v18, %v3866_v10 }
 0xdf0   :  { %v1892_v20 = vsel %vm616_vm3, %v1625_v15, -inf }
 0xdf1   :  { %1893 = vmax.xlane.f32.xlu1 %v1892_v20  ;;  %v1889_v21 = vsel %vm616_vm3, %v1620_v19, -inf }
 0xdf2   :  { %1890 = vmax.xlane.f32.xlu0 %v1889_v21 }
 0xe5a   :  { %v3146_v22 = vpop.f32.mrb[10].mxu0 }
 0xe5b   :  { %v1712_v57 = vadd.f32 %v3146_v22, %v3864_v9  ;;  %v1706_v23 = vpop.f32.mrb[11].mxu0 }
 0xe5c   :  { %v1707_v24 = vadd.f32 %v1706_v23, %v3866_v10 }
 0xe5d   :  { %v1898_v25 = vsel %vm616_vm3, %v1712_v57, -inf }
 0xe5e   :  { %1899 = vmax.xlane.f32.xlu0 %v1898_v25  ;;  %v1895_v29 = vsel %vm616_vm3, %v1707_v24, -inf }
 0xe61   :  { %v3153_v27 = vpop.f32.mrb[18].mxu1 }
 0xe62   :  { %v1799_v31 = vadd.f32 %v3153_v27, %v3864_v9  ;;  %v1793_v53 = vpop.f32.mrb[19].mxu1  ;;  %1896 = vmax.xlane.f32.xlu0 %v1895_v29 }
 0xe63   :  { %v1794_v33 = vadd.f32 %v1793_v53, %v3866_v10 }
 0xe64   :  { %v1904_v46 = vsel %vm616_vm3, %v1799_v31, -inf }
 0xe65   :  { %v3160_v35 = vpop.f32.mrb[12].mxu0  ;;  %1905 = vmax.xlane.f32.xlu1 %v1904_v46  ;;  %v1901_v36 = vsel %vm616_vm3, %v1794_v33, -inf }
 0xe66   :  { %v1886_v60 = vadd.f32 %v3160_v35, %v3864_v9  ;;  %v1880_v37 = vpop.f32.mrb[13].mxu0  ;;  %1902 = vmax.xlane.f32.xlu0 %v1901_v36 }
 0xe67   :  { %v1881_v39 = vadd.f32 %v1880_v37, %v3866_v10 }
 0xe68   :  { %v1910_v43 = vsel %vm616_vm3, %v1886_v60, -inf }
 0xe69   :  { %1911 = vmax.xlane.f32.xlu1 %v1910_v43  ;;  %v1907_v44 = vsel %vm616_vm3, %v1881_v39, -inf }
 0xe6a   :  { %1908 = vmax.xlane.f32.xlu0 %v1907_v44 }
 0xe7e   :  { %v1894_v45 = vpop.xlane.xlu1 %1893 }
 0xe7f   :  { %v1914_v48 = vsub.f32 %v1625_v15, %v1894_v45  ;;  %v1891_v34 = vpop.xlane.xlu0 %1890 }
 0xe80   :  { %v1913_v51 = vsub.f32 %v1620_v19, %v1891_v34 }
 0xe81   :  { %v1923_v52 = vmul.f32 1.442695, %v1914_v48 }
 0xe82   :  { %v1921_v55 = vmul.f32 1.442695, %v1913_v51 }
 0xe83   :  { %3549 = vpow2.f32 %v1923_v52 }
 0xe84   :  { %3551 = vpow2.f32 %v1921_v55 }
 0xe8d   :  { %v4121_v56 = vpop.eup %3549 }
 0xe8e   :  { %v3552_v9 = vpop.eup %3551  ;;  %v1940_v10 = vsel %vm616_vm3, %v4121_v56, 0.0 }
 0xe8f   :  { %1941 = vadd.xlane.f32.xlu1 %v1940_v10  ;;  %v1937_v40 = vsel %vm616_vm3, %v3552_v9, 0.0 }
 0xe90   :  { %1938 = vadd.xlane.f32.xlu0 %v1937_v40 }
 0xeeb   :  { %v1900_v59 = vpop.xlane.xlu0 %1899 }
 0xeec   :  { %v1916_v61 = vsub.f32 %v1712_v57, %v1900_v59 }
 0xeee   :  { %v1927_v62 = vmul.f32 1.442695, %v1916_v61 }
 0xeef   :  { %v1897_v63 = vpop.xlane.xlu0 %1896 }
 0xef0   :  { %3553 = vpow2.f32 %v1927_v62  ;;  %v1915_v47 = vsub.f32 %v1707_v24, %v1897_v63 }
 0xef2   :  { %v1925_v1 = vmul.f32 1.442695, %v1915_v47  ;;  %v1906_v2 = vpop.xlane.xlu1 %1905 }
 0xef3   :  { %v1918_v3 = vsub.f32 %v1799_v31, %v1906_v2  ;;  %v1903_v4 = vpop.xlane.xlu0 %1902 }
 0xef4   :  { %3555 = vpow2.f32 %v1925_v1  ;;  %v1917_v6 = vsub.f32 %v1794_v33, %v1903_v4 }
 0xef5   :  { %v1931_v7 = vmul.f32 1.442695, %v1918_v3 }
 0xef6   :  { %v1929_v8 = vmul.f32 1.442695, %v1917_v6  ;;  %v1912_v11 = vpop.xlane.xlu1 %1911 }
 0xef7   :  { %3557 = vpow2.f32 %v1931_v7  ;;  %v1920_v12 = vsub.f32 %v1886_v60, %v1912_v11  ;;  %v1909_v13 = vpop.xlane.xlu0 %1908 }
 0xef8   :  { %3559 = vpow2.f32 %v1929_v8  ;;  %v1919_v14 = vsub.f32 %v1881_v39, %v1909_v13 }
 0xef9   :  { %v1935_v16 = vmul.f32 1.442695, %v1920_v12 }
 0xefa   :  { %v4126_v17 = vpop.eup %3553  ;;  %v1933_v15 = vmul.f32 1.442695, %v1919_v14  ;;  %v89_v14 = vld [vmem:[%s4306_s5 + $0x20] sm:$0xff] }
 0xefb   :  { %3561 = vpow2.f32 %v1935_v16  ;;  %v1946_v18 = vsel %vm616_vm3, %v4126_v17, 0.0  ;;  %v90_v16 = vld [vmem:[%s4306_s5 + $0x28] sm:$0xff] }
 0xefc   :  { %3563 = vpow2.f32 %v1933_v15  ;;  %1947 = vadd.xlane.f32.xlu1 %v1946_v18  ;;  %v91_v15 = vld [vmem:[%s4306_s5 + $0x30] sm:$0xff]  ;;  %v92_v18 = vld [vmem:[%s4306_s5 + $0x38] sm:$0xff] }
 0xefe   :  { %v4130_v19 = vpop.eup %3555 }
 0xeff   :  { %v1943_v20 = vsel %vm616_vm3, %v4130_v19, 0.0 }
 0xf00   :  { %1944 = vadd.xlane.f32.xlu0 %v1943_v20 }
 0xf01   :  { %v4134_v21 = vpop.eup %3557 }
 0xf02   :  { %v3560_v22 = vpop.eup %3559  ;;  %v1952_v57 = vsel %vm616_vm3, %v4134_v21, 0.0 }
 0xf03   :  { %1953 = vadd.xlane.f32.xlu1 %v1952_v57  ;;  %v1949_v23 = vsel %vm616_vm3, %v3560_v22, 0.0 }
 0xf04   :  { %1950 = vadd.xlane.f32.xlu0 %v1949_v23 }
 0xf05   :  { %v4139_v24 = vpop.eup %3561 }
 0xf06   :  { %v4141_v25 = vpop.eup %3563  ;;  %v1958_v27 = vsel %vm616_vm3, %v4139_v24, 0.0 }
 0xf07   :  { %1959 = vadd.xlane.f32.xlu1 %v1958_v27  ;;  %v1955_v29 = vsel %vm616_vm3, %v4141_v25, 0.0 }
 0xf08   :  { %1956 = vadd.xlane.f32.xlu0 %v1955_v29 }
 0xf18   :  { %3487 = vrot.lane.b32.xlu1 %v4070_v54, %s3673_s27 }
 0xf1c   :  { %3492 = vrot.lane.b32.xlu1 %v4075_v38, %s3673_s27  ;;  %v1942_v46 = vpop.xlane.xlu1 %1941 }
 0xf1d   :  { %v1939_v31 = vpop.xlane.xlu0 %1938 }
 0xf1e   :  { %3565 = vrcp.f32 %v1939_v31  ;;  %3482 = vrot.lane.b32.xlu0 %v4064_v50, %s3673_s27 }
 0xf20   :  { %3497 = vrot.lane.b32.xlu1 %v4079_v0, %s3673_s27 }
 0xf28   :  { %v3566_v53 = vpop.eup %3565 }
 0xf29   :  { %v1962_v33 = vmul.f32 %v3566_v53, %v3552_v9 }
 0xf2b   :  { %3165 = vmatprep.mubr.msk.f32.mxu1 %vm616_vm3, %v1962_v33 }
 0xf89   :  { %v1948_v35 = vpop.xlane.xlu1 %1947 }
 0xf8d   :  { %v1945_v36 = vpop.xlane.xlu0 %1944 }
 0xf90   :  { %v1954_v60 = vpop.xlane.xlu1 %1953 }
 0xf91   :  { %v1951_v54 = vpop.xlane.xlu0 %1950 }
 0xf92   :  { %3567 = vrcp.f32 %v1951_v54 }
 0xf93   :  { %3569 = vrcp.f32 %v1942_v46 }
 0xf94   :  { %3571 = vrcp.f32 %v1945_v36  ;;  %v1960_v38 = vpop.xlane.xlu1 %1959 }
 0xf95   :  { %v1957_v37 = vpop.xlane.xlu0 %1956  ;;  %3573 = vrcp.f32 %v1954_v60 }
 0xf96   :  { %3575 = vrcp.f32 %v1948_v35 }
 0xf97   :  { %3577 = vrcp.f32 %v1957_v37 }
 0xf98   :  { %v3488_v50 = vpop.permute.xlu1 %3487  ;;  %3579 = vrcp.f32 %v1960_v38 }
 0xf99   :  { %v3483_v39 = vpop.permute.xlu0 %3482  ;;  %v3490_v0 = vunpack.i.h.bf16 %v3488_v50  ;;  %v3489_v43 = vunpack.i.l.bf16 %v3488_v50 }
 0xf9a   :  { %v3485_v44 = vunpack.i.h.bf16 %v3483_v39  ;;  %v3484_v45 = vunpack.i.l.bf16 %v3483_v39  ;;  %v4198_v39 = vld [vmem:[%s4310_s9 + $0x8] sm:$0x3f] }
 0xf9b   :  { %v3357_v59 = vpack.c.bf16 %v3490_v0, %v3489_v43  ;;  %v2358_v0 = vrot.slane %v4198_v39, %v3791_v28 }
 0xf9c   :  { %v3568_v48 = vpop.eup %3567  ;;  %v3353_v34 = vpack.c.bf16 %v3485_v44, %v3484_v45  ;;  %v3493_v51 = vpop.permute.xlu1 %3492 }
 0xf9d   :  { %v3570_v52 = vpop.eup %3569  ;;  %v3495_v55 = vunpack.i.h.bf16 %v3493_v51  ;;  %v3494_v9 = vunpack.i.l.bf16 %v3493_v51  ;;  %v1970_v10 = vmul.f32 %v3568_v48, %v3560_v22 }
 0xf9e   :  { %v3572_v40 = vpop.eup %3571  ;;  %3354 = vmatprep.subr.bf16.mxu1 %v3353_v34  ;;  %v1964_v63 = vmul.f32 %v3570_v52, %v4121_v56 }
 0xf9f   :  { %v3361_v61 = vpack.c.bf16 %v3495_v55, %v3494_v9  ;;  %3356 = vmatpush3.bf16.msra.mxu1 %v3353_v34  ;;  %3179 = vmatprep.mubr.msk.f32.mxu0 %vm616_vm3, %v1970_v10  ;;  %v3574_v62 = vpop.eup %3573  ;;  %v1966_v4 = vmul.f32 %v3572_v40, %v4130_v19  ;;  %v3373_v19 = vpack.c.bf16 %v92_v18, %v91_v15 }
 0xfa0   :  { %v3498_v47 = vpop.permute.xlu1 %3497  ;;  %3358 = vmatprep.subr.bf16.mxu1 %v3357_v59  ;;  %v3576_v1 = vpop.eup %3575  ;;  %v1972_v7 = vmul.f32 %v3574_v62, %v4134_v21  ;;  %v2477_v15 = vrot.slane %v4198_v39, %v1205_v5  ;;  %v113_v5 = vld [vmem:[%s4309_s8 + $0x50] sm:$0xff] }
 0xfa1   :  { %v3500_v2 = vunpack.i.h.bf16 %v3498_v47  ;;  %v3499_v3 = vunpack.i.l.bf16 %v3498_v47  ;;  %3362 = vmatprep.subr.bf16.mxu0 %v3361_v61  ;;  %v3578_v6 = vpop.eup %3577  ;;  %v1968_v56 = vmul.f32 %v3576_v1, %v4126_v17  ;;  %v3369_v17 = vpack.c.bf16 %v90_v16, %v89_v14  ;;  %v98_v1 = vld [vmem:[%s4307_s6 + $0x28] sm:$0xff] }
 0xfa2   :  { %3166 = vmatmul.mubr.msk.f32.vlgmr.msra.gmra.mrb[20].mxu1 %vm616_vm3, %v1964_v63  ;;  %3364 = vmatpush3.bf16.msra.mxu0 %v3361_v61  ;;  %v3580_v11 = vpop.eup %3579  ;;  %v1974_v12 = vmul.f32 %v3578_v6, %v4141_v25  ;;  %v2471_v14 = vrot.slane %v4198_v39, %v3797_v30  ;;  %v111_v30 = vld [vmem:[%s4309_s8 + $0x40] sm:$0xff] }
 0xfa3   :  { %v3365_v8 = vpack.c.bf16 %v3500_v2, %v3499_v3  ;;  %3360 = vmatpush3.bf16.msra.mxu1 %v3357_v59  ;;  %3172 = vmatprep.mubr.msk.f32.mxu1 %vm616_vm3, %v1966_v4  ;;  %v1976_v13 = vmul.f32 %v3580_v11, %v4139_v24  ;;  %v99_v3 = vld [vmem:[%s4307_s6 + $0x30] sm:$0xff]  ;;  %v100_v4 = vld [vmem:[%s4307_s6 + $0x38] sm:$0xff] }
 0xfa4   :  { %3370 = vmatprep.subr.bf16.mxu0 %v3369_v17  ;;  %v3381_v6 = vpack.c.bf16 %v100_v4, %v99_v3 }
 0xfa5   :  { %3180 = vmatmul.mubr.msk.f32.vlgmr.msra.gmra.mrb[14].mxu0 %vm616_vm3, %v1972_v7  ;;  %3366 = vmatprep.subr.bf16.mxu1 %v3365_v8 }
 0xfa6   :  { %3173 = vmatmul.mubr.msk.f32.vlgmr.msra.gmra.mrb[22].mxu1 %vm616_vm3, %v1968_v56  ;;  %3372 = vmatpush3.bf16.msra.mxu0 %v3369_v17 }
 0xfa7   :  { %3368 = vmatpush3.bf16.msra.mxu1 %v3365_v8  ;;  %3186 = vmatprep.mubr.msk.f32.mxu1 %vm616_vm3, %v1974_v12 }
 0xfa8   :  { %3374 = vmatprep.subr.bf16.mxu0 %v3373_v19 }
 0xfaa   :  { %3187 = vmatmul.mubr.msk.f32.vlgmr.msra.gmra.mrb[24].mxu1 %vm616_vm3, %v1976_v13  ;;  %3376 = vmatpush3.bf16.msra.mxu0 %v3373_v19 }
0x1075   :  { %v3167_v20 = vpop.f32.mrb[20].mxu1 }
0x1076   :  { %v2055_v21 = vpop.f32.mrb[21].mxu1 }
0x1078   :  { %v3181_v22 = vpop.f32.mrb[14].mxu0 }
0x1079   :  { %v3174_v57 = vpop.f32.mrb[22].mxu1  ;;  %v2229_v23 = vpop.f32.mrb[15].mxu0 }
0x107a   :  { %2329 = vrot.lane.b32.xlu1 %v3174_v57, %s3667_s14  ;;  %v2142_v24 = vpop.f32.mrb[23].mxu1 }
0x107b   :  { %2327 = vrot.lane.b32.xlu0 %v2142_v24, %s3667_s14 }
0x107d   :  { %v3188_v25 = vpop.f32.mrb[24].mxu1 }
0x107e   :  { %2337 = vrot.lane.b32.xlu1 %v3181_v22, %s3674_s17  ;;  %v2316_v27 = vpop.f32.mrb[25].mxu1 }
0x107f   :  { %2335 = vrot.lane.b32.xlu0 %v2229_v23, %s3674_s17  ;;  %v112_v23 = vld [vmem:[%s4309_s8 + $0x48] sm:$0xff] }
0x1080   :  { %v3385_v24 = vpack.c.bf16 %v112_v23, %v111_v30 }
0x1082   :  { %2345 = vrot.lane.b32.xlu1 %v3188_v25, %s3675_s18  ;;  %3386 = vmatprep.subr.bf16.mxu0 %v3385_v24  ;;  %v114_v25 = vld [vmem:[%s4309_s8 + $0x58] sm:$0xff] }
0x1083   :  { %2343 = vrot.lane.b32.xlu0 %v2316_v27, %s3675_s18  ;;  %v3389_v27 = vpack.c.bf16 %v114_v25, %v113_v5 }
0x10ec   :  { %v2330_v29 = vpop.permute.xlu1 %2329 }
0x10ed   :  { %v2328_v31 = vpop.permute.xlu0 %2327  ;;  %v2350_v36 = vsel %vm271_vm1, %v3167_v20, %v2330_v29  ;;  %v115_v29 = vld [vmem:[%s4309_s8 + $0x60] sm:$0xff] }
0x10ee   :  { %v2349_v46 = vsel %vm271_vm1, %v2055_v21, %v2328_v31  ;;  %v116_v31 = vld [vmem:[%s4309_s8 + $0x68] sm:$0xff] }
0x10f0   :  { %v2338_v53 = vpop.permute.xlu1 %2337 }
0x10f1   :  { %v2336_v33 = vpop.permute.xlu0 %2335  ;;  %v2352_v38 = vsel %vm616_vm3, %v2350_v36, %v2338_v53  ;;  %v3393_v53 = vpack.c.bf16 %v116_v31, %v115_v29  ;;  %v2880_v36 = vld [vmem:[%s4308_s7 + $0x1] ss:$0 sm:$0xff]  ;;  %v2701_v29 = vrot.slane %v4198_v39, %v1430_v32  ;;  %v2885_v32 = vld [vmem:[%s4312_s11] ss:$0 sm:$0xff] }
0x10f2   :  { %v2351_v60 = vsel %vm616_vm3, %v2349_v46, %v2336_v33  ;;  %v117_v33 = vld [vmem:[%s4309_s8 + $0x70] sm:$0xff]  ;;  %v118_v46 = vld [vmem:[%s4309_s8 + $0x78] sm:$0xff] }
0x10f4   :  { %v2346_v35 = vpop.permute.xlu1 %2345 }
0x10f5   :  { %v2344_v54 = vpop.permute.xlu0 %2343  ;;  %v2354_v50 = vsel %vm1081_vm4, %v2352_v38, %v2346_v35  ;;  %v3397_v35 = vpack.c.bf16 %v118_v46, %v117_v33 }
0x10f6   :  { %v2353_v37 = vsel %vm1081_vm4, %v2351_v60, %v2344_v54 }
0x10f7   :  { %3197 = vmatprep.mubr.msk.f32.mxu0 %vm126_vm0, %v2353_v37 }
0x10f8   :  { %3198 = vmatmul.mubr.msk.f32.vlgmr.msra.gmra.mrb[16].mxu0 %vm126_vm0, %v2354_v50 }
0x10f9   :  { %3388 = vmatpush3.bf16.msra.mxu0 %v3385_v24 }
0x10fa   :  { %3390 = vmatprep.subr.bf16.mxu0 %v3389_v27 }
0x10fd   :  { %3392 = vmatpush3.bf16.msra.mxu0 %v3389_v27 }
0x10fe   :  { %3394 = vmatprep.subr.bf16.mxu0 %v3393_v53 }
0x1101   :  { %3396 = vmatpush3.bf16.msra.mxu0 %v3393_v53 }
0x1102   :  { %3398 = vmatprep.subr.bf16.mxu0 %v3397_v35 }
0x1105   :  { %3400 = vmatpush3.bf16.msra.mxu0 %v3397_v35  ;;  %v2707_v35 = vrot.slane %v4198_v39, %v1436_v49 }
0x11cb   :  { %v3199_v43 = vpop.f32.mrb[16].mxu0 }
0x11cc   :  { %v2437_v44 = vadd.f32 %v3199_v43, %v2358_v0  ;;  %v2431_v45 = vpop.f32.mrb[17].mxu0 }
0x11cd   :  { %v2432_v48 = vadd.f32 %v2431_v45, %v2358_v0 }
0x11ce   :  { %v2441_v34 = vadd.f32 %v2437_v44, %v4050_v42 }
0x11cf   :  { %v2440_v51 = vadd.f32 %v2432_v48, %v4048_v41  ;;  %v97_v41 = vld [vmem:[%s4307_s6 + $0x20] sm:$0xff] }
0x11d0   :  { %v2445_v52 = vsel %vm126_vm0, %v2441_v34, 0.0  ;;  %v3377_v2 = vpack.c.bf16 %v98_v1, %v97_v41 }
0x11d1   :  { %2446 = vadd.xlane.f32.xlu1 %v2445_v52  ;;  %v2442_v55 = vsel %vm126_vm0, %v2440_v51, 0.0 }
0x11d2   :  { %2443 = vadd.xlane.f32.xlu0 %v2442_v55  ;;  %3378 = vmatprep.subr.bf16.mxu1 %v3377_v2 }
0x11d3   :  { %3380 = vmatpush3.bf16.msra.mxu1 %v3377_v2 }
0x11d4   :  { %3382 = vmatprep.subr.bf16.mxu1 %v3381_v6 }
0x11d7   :  { %3384 = vmatpush3.bf16.msra.mxu1 %v3381_v6 }
0x125e   :  { %v2447_v9 = vpop.xlane.xlu1 %2446 }
0x125f   :  { %v2449_v10 = vmul.f32 0.03125, %v2447_v9  ;;  %v2444_v40 = vpop.xlane.xlu0 %2443 }
0x1260   :  { %v2448_v59 = vmul.f32 0.03125, %v2444_v40 }
0x1261   :  { %v2451_v61 = vsub.f32 %v2441_v34, %v2449_v10 }
0x1262   :  { %v2450_v28 = vsub.f32 %v2440_v51, %v2448_v59 }
0x1263   :  { %v2453_v47 = vmul.f32 %v2451_v61, %v2451_v61 }
0x1264   :  { %v2452_v62 = vmul.f32 %v2450_v28, %v2450_v28 }
0x1265   :  { %v2457_v42 = vsel %vm126_vm0, %v2453_v47, 0.0  ;;  %v2588_v47 = vrot.slane %v4198_v39, %v1316_v58 }
0x1266   :  { %v2454_v63 = vsel %vm126_vm0, %v2452_v62, 0.0 }
0x1267   :  { %2455 = vadd.xlane.f32.xlu0 %v2454_v63 }
0x126b   :  { %2458 = vadd.xlane.f32.xlu0 %v2457_v42 }
0x12f4   :  { %v2456_v7 = vpop.xlane.xlu0 %2455 }
0x12f5   :  { %v2460_v8 = vmul.f32 0.03125, %v2456_v7 }
0x12f7   :  { %v2462_v56 = vadd.f32 1e-12, %v2460_v8 }
0x12f8   :  { %v2459_v11 = vpop.xlane.xlu0 %2458 }
0x12f9   :  { %3581 = vrsqrt.f32 %v2462_v56  ;;  %v2461_v12 = vmul.f32 0.03125, %v2459_v11 }
0x12fb   :  { %v2463_v13 = vadd.f32 1e-12, %v2461_v12 }
0x12fd   :  { %3583 = vrsqrt.f32 %v2463_v13 }
0x1303   :  { %v3582_v16 = vpop.eup %3581 }
0x1304   :  { %v2466_v17 = vmul.f32 %v3582_v16, %v2450_v28 }
0x1306   :  { %v2472_v18 = vmul.f32 %v2471_v14, %v2466_v17 }
0x1307   :  { %v3584_v19 = vpop.eup %3583 }
0x1308   :  { %v2467_v20 = vmul.f32 %v3584_v19, %v2451_v61  ;;  %v2478_v21 = vadd.f32 %v2477_v15, %v2472_v18  ;;  %v121_v18 = vld [vmem:[%s4311_s10] sm:$0xff]  ;;  %v122_v19 = vld [vmem:[%s4311_s10 + $0x8] sm:$0xff] }
0x130a   :  { %v2473_v22 = vmul.f32 %v2471_v14, %v2467_v20  ;;  %3208 = vmatprep.mubr.msk.f32.mxu1 %vm126_vm0, %v2478_v21  ;;  %v3401_v20 = vpack.c.bf16 %v122_v19, %v121_v18 }
0x130c   :  { %v2479_v57 = vadd.f32 %v2477_v15, %v2473_v22  ;;  %3402 = vmatprep.subr.bf16.mxu1 %v3401_v20  ;;  %v124_v22 = vld [vmem:[%s4311_s10 + $0x18] sm:$0xff] }
0x130e   :  { %3209 = vmatmul.mubr.msk.f32.vlgmr.msra.gmra.mrb[26].mxu1 %vm126_vm0, %v2479_v57 }
0x130f   :  { %3404 = vmatpush3.bf16.msra.mxu1 %v3401_v20 }
0x13e1   :  { %v3210_v60 = vpop.f32.mrb[26].mxu1 }
0x13e2   :  { %v2564_v54 = vadd.f32 %v3210_v60, %v2880_v36  ;;  %v2558_v38 = vpop.f32.mrb[27].mxu1 }
0x13e3   :  { %v2559_v37 = vadd.f32 %v2880_v36, %v2558_v38 }
0x13e4   :  { %v2568_v50 = vmul.f32 %v2564_v54, %v2564_v54 }
0x13e5   :  { %v2567_v0 = vmul.f32 %v2559_v37, %v2559_v37 }
0x13e6   :  { %v2570_v43 = vmul.f32 %v2568_v50, %v2564_v54 }
0x13e7   :  { %v2569_v44 = vmul.f32 %v2567_v0, %v2559_v37 }
0x13e8   :  { %v2572_v45 = vmul.f32 0.044715, %v2570_v43 }
0x13e9   :  { %v2571_v48 = vmul.f32 0.044715, %v2569_v44 }
0x13ea   :  { %v2574_v34 = vadd.f32 %v2572_v45, %v2564_v54 }
0x13eb   :  { %v2573_v51 = vadd.f32 %v2571_v48, %v2559_v37 }
0x13ec   :  { %v2576_v52 = vmul.f32 0.7978846, %v2574_v34 }
0x13ed   :  { %v2575_v55 = vmul.f32 0.7978846, %v2573_v51 }
0x13ee   :  { %3585 = vtanh.f32 %v2576_v52 }
0x13ef   :  { %3587 = vtanh.f32 %v2575_v55 }
0x13f8   :  { %v3586_v9 = vpop.eup %3585 }
0x13f9   :  { %v3588_v10 = vpop.eup %3587  ;;  %v2580_v40 = vadd.f32 1.0, %v3586_v9 }
0x13fa   :  { %v2579_v59 = vadd.f32 1.0, %v3588_v10 }
0x13fb   :  { %v2582_v61 = vmul.f32 0.5, %v2580_v40 }
0x13fc   :  { %v2581_v28 = vmul.f32 0.5, %v2579_v59 }
0x13fd   :  { %v2584_v63 = vmul.f32 %v2582_v61, %v2564_v54 }
0x13fe   :  { %v2583_v62 = vmul.f32 %v2581_v28, %v2559_v37 }
0x1400   :  { %3227 = vmatprep.mubr.msk.f32.mxu0 %vm1318_vm5, %v2583_v62 }
0x1401   :  { %3228 = vmatmul.mubr.msk.f32.vlgmr.msra.gmra.mrb[18].mxu0 %vm1318_vm5, %v2584_v63 }
0x14d4   :  { %v3229_v42 = vpop.f32.mrb[18].mxu0 }
0x14d5   :  { %v2667_v41 = vadd.f32 %v3229_v42, %v2588_v47  ;;  %v2661_v1 = vpop.f32.mrb[19].mxu0 }
0x14d6   :  { %v2662_v2 = vadd.f32 %v2661_v1, %v2588_v47 }
0x14d7   :  { %v2671_v3 = vadd.f32 %v2667_v41, %v2479_v57 }
0x14d8   :  { %v2670_v4 = vadd.f32 %v2662_v2, %v2478_v21  ;;  %v123_v21 = vld [vmem:[%s4311_s10 + $0x10] sm:$0xff] }
0x14d9   :  { %v2675_v6 = vsel %vm126_vm0, %v2671_v3, 0.0  ;;  %v3405_v57 = vpack.c.bf16 %v124_v22, %v123_v21 }
0x14da   :  { %2676 = vadd.xlane.f32.xlu1 %v2675_v6  ;;  %v2672_v7 = vsel %vm126_vm0, %v2670_v4, 0.0 }
0x14db   :  { %2673 = vadd.xlane.f32.xlu0 %v2672_v7  ;;  %3406 = vmatprep.subr.bf16.mxu1 %v3405_v57 }
0x14dc   :  { %3408 = vmatpush3.bf16.msra.mxu1 %v3405_v57 }
0x1567   :  { %v2677_v8 = vpop.xlane.xlu1 %2676 }
0x1568   :  { %v2679_v56 = vmul.f32 0.03125, %v2677_v8  ;;  %v2674_v11 = vpop.xlane.xlu0 %2673 }
0x1569   :  { %v2678_v12 = vmul.f32 0.03125, %v2674_v11 }
0x156a   :  { %v2681_v13 = vsub.f32 %v2671_v3, %v2679_v56 }
0x156b   :  { %v2680_v14 = vsub.f32 %v2670_v4, %v2678_v12 }
0x156c   :  { %v2683_v16 = vmul.f32 %v2681_v13, %v2681_v13 }
0x156d   :  { %v2682_v58 = vmul.f32 %v2680_v14, %v2680_v14 }
0x156e   :  { %v2687_v17 = vsel %vm126_vm0, %v2683_v16, 0.0 }
0x156f   :  { %2688 = vadd.xlane.f32.xlu1 %v2687_v17  ;;  %v2684_v15 = vsel %vm126_vm0, %v2682_v58, 0.0 }
0x1570   :  { %2685 = vadd.xlane.f32.xlu0 %v2684_v15 }
0x15fc   :  { %v2689_v30 = vpop.xlane.xlu1 %2688 }
0x15fd   :  { %v2691_v23 = vmul.f32 0.03125, %v2689_v30  ;;  %v2686_v24 = vpop.xlane.xlu0 %2685 }
0x15fe   :  { %v2690_v5 = vmul.f32 0.03125, %v2686_v24 }
0x15ff   :  { %v2693_v25 = vadd.f32 1e-12, %v2691_v23 }
0x1600   :  { %v2692_v27 = vadd.f32 1e-12, %v2690_v5 }
0x1601   :  { %3589 = vrsqrt.f32 %v2693_v25 }
0x1602   :  { %3591 = vrsqrt.f32 %v2692_v27 }
0x160b   :  { %v3590_v31 = vpop.eup %3589 }
0x160c   :  { %v3592_v53 = vpop.eup %3591  ;;  %v2697_v33 = vmul.f32 %v3590_v31, %v2681_v13 }
0x160d   :  { %v2696_v46 = vmul.f32 %v3592_v53, %v2680_v14 }
0x160e   :  { %v2703_v36 = vmul.f32 %v2701_v29, %v2697_v33 }
0x160f   :  { %v2702_v60 = vmul.f32 %v2701_v29, %v2696_v46 }
0x1610   :  { %v2709_v38 = vadd.f32 %v2707_v35, %v2703_v36 }
0x1611   :  { %v2708_v54 = vadd.f32 %v2707_v35, %v2702_v60 }
0x1613   :  { %3238 = vmatprep.mubr.msk.f32.mxu1 %vm126_vm0, %v2708_v54 }
0x1614   :  { %3239 = vmatmul.mubr.msk.f32.vlgmr.msra.gmra.mrb[28].mxu1 %vm126_vm0, %v2709_v38 }
0x16e7   :  { %v3240_v37 = vpop.f32.mrb[28].mxu1 }
0x16e8   :  { %v2794_v50 = vadd.f32 %v3240_v37, %v2885_v32  ;;  %v2788_v0 = vpop.f32.mrb[29].mxu1 }
0x16e9   :  { %v2789_v26 = vadd.f32 %v2885_v32, %v2788_v0 }
0x16ea   :  { %2798 = vst [vmem:[#allocation7 + $0x8] sm:$0xff] %v2794_v50 }
0x16eb   :  { %2797 = vst [vmem:[#allocation7] sm:$0xff] %v2789_v26 }
0x16ec   :  { %3648 = shalt.err (!%p3645_p6)
}
0x16ed   :  { %s3649_s11 = scalar_lea.hbm %s4313_s12, 256 }
0x16ee   :  { %p3650_p7 = scmp.ne.s32.totalorder %s4313_s12, %s3649_s11  ;;  %p3653_p8 = scmp.lt.u32.totalorder %s3649_s11, %s4313_s12 }
0x16f0   :  { %p3655_p9 = pnand %p3653_p8, %p3650_p7 }
0x16f2   :  { %3658 = shalt.err (!%p3655_p9)
}
0x16f3   :  { %2810 = dma.vmem_to_hbm [thread:$0]  %s2805_s15, 256, %s4313_s12, [#allocation4], %s3666_s13, %s3666_s13, %s3667_s14  }
0x16f4   :  { %3663 = dma.done.wait [#allocation4], 256  }
0x16f5   :  { %3664 = vsyncadd [#allocation4], 4294967040 }
0x16f6   :  { %2814 = vsyncpa [#allocation3], 1 }
0x16f7   :  { %2815 = vsyncpa [#allocation6], 1 }
0x16f8   :  { %2816 = vsyncpa [#allocation4], 1 }

</bundles_post_ra>
